<compile_context>
chip_gen: v6e
topology: v6e:2x2x1
jax: 0.10.0
libtpu: 0.0.40
codegen_flags: <defaults>
</compile_context>

<pallas_src>
import jax
import jax.numpy as jnp
from jax.experimental import pallas as pl
from jax.experimental.pallas import tpu as pltpu


def _round_up(x, m):
    return (x + m - 1) // m * m


# ---------------------------------------------------------------------------
# Kernel
# ---------------------------------------------------------------------------
def actor_forward_kernel(x_ref, w1_ref, b1_ref, w2_ref, b2_ref, o_ref):
    # Layer 1: tanh(x @ W1 + b1)  -- MXU matmul, f32 accumulation; tanh on EUP.
    h1 = jnp.dot(x_ref[...].astype(w1_ref.dtype), w1_ref[...],
                 preferred_element_type=jnp.float32)
    h1 = jnp.tanh(h1 + b1_ref[...].astype(jnp.float32))
    # Layer 2: tanh(h1 @ W2 + b2) -- downcast only at the matmul input.
    h2 = jnp.dot(h1.astype(w2_ref.dtype), w2_ref[...],
                 preferred_element_type=jnp.float32)
    h2 = jnp.tanh(h2 + b2_ref[...].astype(jnp.float32))
    o_ref[...] = h2.astype(o_ref.dtype)


# ---------------------------------------------------------------------------
# Params: init + one-time lane padding (hoisted out of the per-step forward)
# ---------------------------------------------------------------------------
def init_actor_params(key, state_dim, net_width, dtype=jnp.float32):
    """nn.Linear-style U(-1/sqrt(fan_in), 1/sqrt(fan_in)) init (W: (in, out))."""
    k1, k2, k3, k4 = jax.random.split(key, 4)
    lim1 = 1.0 / jnp.sqrt(jnp.float32(state_dim))
    lim2 = 1.0 / jnp.sqrt(jnp.float32(net_width))
    w1 = jax.random.uniform(k1, (state_dim, net_width), dtype, -lim1, lim1)
    b1 = jax.random.uniform(k2, (1, net_width), dtype, -lim1, lim1)
    w2 = jax.random.uniform(k3, (net_width, net_width), dtype, -lim2, lim2)
    b2 = jax.random.uniform(k4, (1, net_width), dtype, -lim2, lim2)
    return w1, b1, w2, b2


def prepare_actor_params(w1, b1, w2, b2):
    """Zero-pad params to a lane-dense width ONCE at init.

    Padding is mathematically inert: padded weight rows/cols and biases are
    zero, so padded output columns are tanh(0)=0 and are either sliced off or
    ignored by the consumer when pad_output=True.
    """
    net_width = w1.shape[1]
    npad = _round_up(net_width, 128)
    if npad != net_width:
        dn = npad - net_width
        w1 = jnp.pad(w1, ((0, 0), (0, dn)))
        b1 = jnp.pad(b1, ((0, 0), (0, dn)))
        w2 = jnp.pad(w2, ((0, dn), (0, dn)))
        b2 = jnp.pad(b2, ((0, 0), (0, dn)))
    params = tuple(jax.device_put(a) for a in (w1, b1, w2, b2))
    return params, net_width


# ---------------------------------------------------------------------------
# Forward wrapper
# ---------------------------------------------------------------------------
def actor_forward(state, padded_params, net_width, *, block_b=512,
                  pad_output=False, single_buffer_weights=True):
    """Pallas Actor.forward.  state: (B, state_dim) -> (B, net_width).

    `padded_params` / `net_width` come from prepare_actor_params (pad once).
    `pad_output=True` returns the lane-dense (B, npad) buffer instead of the
    sliced (B, net_width) view, so a downstream kernel can consume it in place.
    """
    B, state_dim = state.shape
    w1, b1, w2, b2 = padded_params
    npad = w1.shape[1]
    out_dtype = state.dtype
    sub = 8 if jnp.dtype(state.dtype).itemsize >= 4 else 16

    # Batch tiling: one grid step for small B (block == full array dims);
    # otherwise even, sublane-aligned tiles with a ragged masked last block.
    if B <= block_b:
        tb, grid_b = B, 1
    else:
        grid_b = pl.cdiv(B, _round_up(block_b, sub))
        tb = _round_up(pl.cdiv(B, grid_b), sub)
        grid_b = pl.cdiv(B, tb)

    itemsz = lambda a: jnp.dtype(a.dtype).itemsize
    weight_bytes = sum(int(a.size) * itemsz(a) for a in (w1, b1, w2, b2))
    weight_bufs = 1 if single_buffer_weights else 2
    stream_bytes = 2 * tb * (state_dim * itemsz(state)
                             + npad * jnp.dtype(out_dtype).itemsize)
    vmem_needed = weight_bufs * weight_bytes + stream_bytes + (4 << 20)
    vmem_limit = int(min(max(vmem_needed, 32 << 20), 64 << 20))

    cost = pl.CostEstimate(
        flops=2 * B * net_width * (state_dim + net_width),
        transcendentals=2 * B * net_width,
        bytes_accessed=(B * state_dim * itemsz(state) + weight_bytes
                        + B * net_width * jnp.dtype(out_dtype).itemsize),
    )

    def _call(single_buffer):
        if single_buffer:
            def resident(shape):
                # Constant index_map => block never changes; 1 buffer suffices.
                return pl.BlockSpec(shape, lambda i: (0, 0),
                                    pipeline_mode=pl.Buffered(1))
        else:
            def resident(shape):
                return pl.BlockSpec(shape, lambda i: (0, 0))
        return pl.pallas_call(
            actor_forward_kernel,
            out_shape=jax.ShapeDtypeStruct((B, npad), out_dtype),
            grid_spec=pl.GridSpec(
                grid=(grid_b,),
                in_specs=[
                    pl.BlockSpec((tb, state_dim), lambda i: (i, 0)),  # streamed
                    resident((state_dim, npad)),                      # W1 resident
                    resident((1, npad)),                              # b1 resident
                    resident((npad, npad)),                           # W2 resident
                    resident((1, npad)),                              # b2 resident
                ],
                out_specs=pl.BlockSpec((tb, npad), lambda i: (i, 0)),
            ),
            compiler_params=pltpu.CompilerParams(
                dimension_semantics=("parallel",),   # v7x: shard batch on 2 TCs
                vmem_limit_bytes=vmem_limit),
            cost_estimate=cost,
        )(state, w1, b1, w2, b2)

    if single_buffer_weights:
        try:
            out = _call(True)
        except Exception:
            # Installed jax lacks pipeline_mode / Buffered(1): default buffering.
            out = _call(False)
    else:
        out = _call(False)

    if pad_output:
        return out                       # lane-dense (B, npad); extra cols are 0
    return out[:, :net_width]


# ---------------------------------------------------------------------------
# Self-test
# ---------------------------------------------------------------------------
if __name__ == "__main__":
    # Small shapes consistent with Actor(state_dim, action_dim, net_width).forward.
    B, state_dim, net_width = 200, 16, 32

    key = jax.random.PRNGKey(0)
    k_params, k_state = jax.random.split(key)
    raw_params = init_actor_params(k_params, state_dim, net_width)
    padded_params, nw = prepare_actor_params(*raw_params)     # pad ONCE at init
    state = jax.random.normal(k_state, (B, state_dim), jnp.float32)

    # Pure-JAX reference (same math as the PyTorch module).
    w1, b1, w2, b2 = raw_params
    ref = jnp.tanh(jnp.tanh(state @ w1 + b1) @ w2 + b2)

    # 1) Default path: one grid step (B <= block_b), weights VMEM-resident.
    out = jax.block_until_ready(actor_forward(state, padded_params, nw))
    assert out.shape == (B, net_width)
    assert jnp.allclose(out, ref, atol=2e-5, rtol=2e-5)

    # 2) Multi-step / ragged-last-block path (coverage; perf default is 1 step).
    out2 = jax.block_until_ready(
        actor_forward(state, padded_params, nw, block_b=64))
    assert jnp.allclose(out2, ref, atol=2e-5, rtol=2e-5)

    # 3) Lane-dense padded output for in-place consumption (e.g. fused .pi()).
    out_pad = jax.block_until_ready(
        actor_forward(state, padded_params, nw, pad_output=True))
    assert out_pad.shape == (B, _round_up(net_width, 128))
    assert jnp.allclose(out_pad[:, :net_width], ref, atol=2e-5, rtol=2e-5)
    assert jnp.all(out_pad[:, net_width:] == 0.0)

    # TODO(synk): .pi() (l3 + softmax) is a separate method, not forward();
    # fuse it into this kernel (consuming the padded buffer) if it becomes hot.
    print("KERNEL_OK")
</pallas_src>

<mosaic_0001>
module attributes {stable_mosaic.version = 11 : i64} {
  func.func @actor_forward_kernel(%arg0: i32, %arg1: memref<200x16xf32, #tpu.memory_space<vmem>>, %arg2: memref<16x128xf32, #tpu.memory_space<vmem>>, %arg3: memref<1x128xf32, #tpu.memory_space<vmem>>, %arg4: memref<128x128xf32, #tpu.memory_space<vmem>>, %arg5: memref<1x128xf32, #tpu.memory_space<vmem>>, %arg6: memref<200x128xf32, #tpu.memory_space<vmem>>) attributes {dimension_semantics = [#tpu.dimension_semantics<parallel>], iteration_bounds = array<i64: 1>, scalar_prefetch = 0 : i64, scratch_operands = 0 : i64, tpu.core_type = #tpu.core_type<tc>, window_params = [{transform_indices = @transform_0, window_bounds = array<i64: 200, 16>}, {pipeline_mode = #tpu.pipeline_mode<synchronous>, transform_indices = @transform_1, window_bounds = array<i64: 16, 128>}, {pipeline_mode = #tpu.pipeline_mode<synchronous>, transform_indices = @transform_2, window_bounds = array<i64: 1, 128>}, {pipeline_mode = #tpu.pipeline_mode<synchronous>, transform_indices = @transform_3, window_bounds = array<i64: 128, 128>}, {pipeline_mode = #tpu.pipeline_mode<synchronous>, transform_indices = @transform_4, window_bounds = array<i64: 1, 128>}, {transform_indices = @transform_5, window_bounds = array<i64: 200, 128>}]} {
    %c0 = arith.constant 0 : index
    %c0_0 = arith.constant 0 : index
    %0 = vector.load %arg1[%c0, %c0_0] : memref<200x16xf32, #tpu.memory_space<vmem>>, vector<200x16xf32>
    %c0_1 = arith.constant 0 : index
    %c0_2 = arith.constant 0 : index
    %1 = vector.load %arg2[%c0_1, %c0_2] : memref<16x128xf32, #tpu.memory_space<vmem>>, vector<16x128xf32>
    %cst = arith.constant dense<0.000000e+00> : vector<200x128xf32>
    %2 = tpu.matmul %0, %1, %cst {dimension_numbers = #tpu.dot_dimension_numbers<[1], [0], [0], [1], [0, 0, 1, 1], [], []>} : vector<200x16xf32>, vector<16x128xf32>, vector<200x128xf32> -> vector<200x128xf32>
    %c0_3 = arith.constant 0 : index
    %c0_4 = arith.constant 0 : index
    %3 = vector.load %arg3[%c0_3, %c0_4] : memref<1x128xf32, #tpu.memory_space<vmem>>, vector<1x128xf32>
    %4 = vector.broadcast %3 : vector<1x128xf32> to vector<200x128xf32>
    %5 = arith.addf %2, %4 : vector<200x128xf32>
    %6 = math.tanh %5 : vector<200x128xf32>
    %c0_5 = arith.constant 0 : index
    %c0_6 = arith.constant 0 : index
    %7 = vector.load %arg4[%c0_5, %c0_6] : memref<128x128xf32, #tpu.memory_space<vmem>>, vector<128x128xf32>
    %cst_7 = arith.constant dense<0.000000e+00> : vector<200x128xf32>
    %8 = tpu.matmul %6, %7, %cst_7 {dimension_numbers = #tpu.dot_dimension_numbers<[1], [0], [0], [1], [0, 0, 1, 1], [], []>} : vector<200x128xf32>, vector<128x128xf32>, vector<200x128xf32> -> vector<200x128xf32>
    %c0_8 = arith.constant 0 : index
    %c0_9 = arith.constant 0 : index
    %9 = vector.load %arg5[%c0_8, %c0_9] : memref<1x128xf32, #tpu.memory_space<vmem>>, vector<1x128xf32>
    %10 = vector.broadcast %9 : vector<1x128xf32> to vector<200x128xf32>
    %11 = arith.addf %8, %10 : vector<200x128xf32>
    %12 = math.tanh %11 : vector<200x128xf32>
    %c0_10 = arith.constant 0 : index
    %c0_11 = arith.constant 0 : index
    %13 = vector.load %arg6[%c0_10, %c0_11] : memref<200x128xf32, #tpu.memory_space<vmem>>, vector<200x128xf32>
    tpu.vector_store %arg6[%c0_10, %c0_11], %12 {strides = array<i32>} : memref<200x128xf32, #tpu.memory_space<vmem>>, vector<200x128xf32>,
    return
  }
  func.func @transform_0(%arg0: i32) -> (i32, i32) {
    %c0_i32 = arith.constant 0 : i32
    %c0_i32_0 = arith.constant 0 : i32
    return %arg0, %c0_i32 : i32, i32
  }
  func.func @transform_1(%arg0: i32) -> (i32, i32) {
    %c0_i32 = arith.constant 0 : i32
    %c0_i32_0 = arith.constant 0 : i32
    %c0_i32_1 = arith.constant 0 : i32
    return %c0_i32, %c0_i32_0 : i32, i32
  }
  func.func @transform_2(%arg0: i32) -> (i32, i32) {
    %c0_i32 = arith.constant 0 : i32
    %c0_i32_0 = arith.constant 0 : i32
    %c0_i32_1 = arith.constant 0 : i32
    return %c0_i32, %c0_i32_0 : i32, i32
  }
  func.func @transform_3(%arg0: i32) -> (i32, i32) {
    %c0_i32 = arith.constant 0 : i32
    %c0_i32_0 = arith.constant 0 : i32
    %c0_i32_1 = arith.constant 0 : i32
    return %c0_i32, %c0_i32_0 : i32, i32
  }
  func.func @transform_4(%arg0: i32) -> (i32, i32) {
    %c0_i32 = arith.constant 0 : i32
    %c0_i32_0 = arith.constant 0 : i32
    %c0_i32_1 = arith.constant 0 : i32
    return %c0_i32, %c0_i32_0 : i32, i32
  }
  func.func @transform_5(%arg0: i32) -> (i32, i32) {
    %c0_i32 = arith.constant 0 : i32
    %c0_i32_0 = arith.constant 0 : i32
    return %arg0, %c0_i32 : i32, i32
  }
}

module attributes {stable_mosaic.version = 11 : i64} {
  func.func @actor_forward_kernel(%arg0: i32, %arg1: memref<200x16xf32, #tpu.memory_space<vmem>>, %arg2: memref<16x128xf32, #tpu.memory_space<vmem>>, %arg3: memref<1x128xf32, #tpu.memory_space<vmem>>, %arg4: memref<128x128xf32, #tpu.memory_space<vmem>>, %arg5: memref<1x128xf32, #tpu.memory_space<vmem>>, %arg6: memref<200x128xf32, #tpu.memory_space<vmem>>) attributes {dimension_semantics = [#tpu.dimension_semantics<parallel>], iteration_bounds = array<i64: 1>, scalar_prefetch = 0 : i64, scratch_operands = 0 : i64, tpu.core_type = #tpu.core_type<tc>, window_params = [{transform_indices = @transform_0, window_bounds = array<i64: 200, 16>}, {pipeline_mode = #tpu.pipeline_mode<synchronous>, transform_indices = @transform_1, window_bounds = array<i64: 16, 128>}, {pipeline_mode = #tpu.pipeline_mode<synchronous>, transform_indices = @transform_2, window_bounds = array<i64: 1, 128>}, {pipeline_mode = #tpu.pipeline_mode<synchronous>, transform_indices = @transform_3, window_bounds = array<i64: 128, 128>}, {pipeline_mode = #tpu.pipeline_mode<synchronous>, transform_indices = @transform_4, window_bounds = array<i64: 1, 128>}, {transform_indices = @transform_5, window_bounds = array<i64: 200, 128>}]} {
    %c0 = arith.constant 0 : index
    %c0_0 = arith.constant 0 : index
    %0 = vector.load %arg1[%c0, %c0_0] : memref<200x16xf32, #tpu.memory_space<vmem>>, vector<200x16xf32>
    %c0_1 = arith.constant 0 : index
    %c0_2 = arith.constant 0 : index
    %1 = vector.load %arg2[%c0_1, %c0_2] : memref<16x128xf32, #tpu.memory_space<vmem>>, vector<16x128xf32>
    %cst = arith.constant dense<0.000000e+00> : vector<200x128xf32>
    %2 = tpu.matmul %0, %1, %cst {dimension_numbers = #tpu.dot_dimension_numbers<[1], [0], [0], [1], [0, 0, 1, 1], [], []>} : vector<200x16xf32>, vector<16x128xf32>, vector<200x128xf32> -> vector<200x128xf32>
    %c0_3 = arith.constant 0 : index
    %c0_4 = arith.constant 0 : index
    %3 = vector.load %arg3[%c0_3, %c0_4] : memref<1x128xf32, #tpu.memory_space<vmem>>, vector<1x128xf32>
    %4 = vector.broadcast %3 : vector<1x128xf32> to vector<200x128xf32>
    %5 = arith.addf %2, %4 : vector<200x128xf32>
    %6 = math.tanh %5 : vector<200x128xf32>
    %c0_5 = arith.constant 0 : index
    %c0_6 = arith.constant 0 : index
    %7 = vector.load %arg4[%c0_5, %c0_6] : memref<128x128xf32, #tpu.memory_space<vmem>>, vector<128x128xf32>
    %cst_7 = arith.constant dense<0.000000e+00> : vector<200x128xf32>
    %8 = tpu.matmul %6, %7, %cst_7 {dimension_numbers = #tpu.dot_dimension_numbers<[1], [0], [0], [1], [0, 0, 1, 1], [], []>} : vector<200x128xf32>, vector<128x128xf32>, vector<200x128xf32> -> vector<200x128xf32>
    %c0_8 = arith.constant 0 : index
    %c0_9 = arith.constant 0 : index
    %9 = vector.load %arg5[%c0_8, %c0_9] : memref<1x128xf32, #tpu.memory_space<vmem>>, vector<1x128xf32>
    %10 = vector.broadcast %9 : vector<1x128xf32> to vector<200x128xf32>
    %11 = arith.addf %8, %10 : vector<200x128xf32>
    %12 = math.tanh %11 : vector<200x128xf32>
    %c0_10 = arith.constant 0 : index
    %c0_11 = arith.constant 0 : index
    %13 = vector.load %arg6[%c0_10, %c0_11] : memref<200x128xf32, #tpu.memory_space<vmem>>, vector<200x128xf32>
    tpu.vector_store %arg6[%c0_10, %c0_11], %12 {strides = array<i32>} : memref<200x128xf32, #tpu.memory_space<vmem>>, vector<200x128xf32>,
    return
  }
  func.func @transform_0(%arg0: i32) -> (i32, i32) {
    %c0_i32 = arith.constant 0 : i32
    %c0_i32_0 = arith.constant 0 : i32
    return %arg0, %c0_i32 : i32, i32
  }
  func.func @transform_1(%arg0: i32) -> (i32, i32) {
    %c0_i32 = arith.constant 0 : i32
    %c0_i32_0 = arith.constant 0 : i32
    %c0_i32_1 = arith.constant 0 : i32
    return %c0_i32, %c0_i32_0 : i32, i32
  }
  func.func @transform_2(%arg0: i32) -> (i32, i32) {
    %c0_i32 = arith.constant 0 : i32
    %c0_i32_0 = arith.constant 0 : i32
    %c0_i32_1 = arith.constant 0 : i32
    return %c0_i32, %c0_i32_0 : i32, i32
  }
  func.func @transform_3(%arg0: i32) -> (i32, i32) {
    %c0_i32 = arith.constant 0 : i32
    %c0_i32_0 = arith.constant 0 : i32
    %c0_i32_1 = arith.constant 0 : i32
    return %c0_i32, %c0_i32_0 : i32, i32
  }
  func.func @transform_4(%arg0: i32) -> (i32, i32) {
    %c0_i32 = arith.constant 0 : i32
    %c0_i32_0 = arith.constant 0 : i32
    %c0_i32_1 = arith.constant 0 : i32
    return %c0_i32, %c0_i32_0 : i32, i32
  }
  func.func @transform_5(%arg0: i32) -> (i32, i32) {
    %c0_i32 = arith.constant 0 : i32
    %c0_i32_0 = arith.constant 0 : i32
    return %arg0, %c0_i32 : i32, i32
  }
}

</mosaic_0001>

<bundles_post_ra>
// kernel: tpu_custom_call.1
= control target key start
LH: loop header
LB: loop body
LE: loop exit
PB: predicated region body
PF: predicated region fallthrough
CT: control target
= control target key end

     0   :  { %v1065_v1 = vmov 0.0   ;;  %vm1066_vm0 = vmmov 0   ;;  %vm55_vm1 = vcmask 130048   ;;  %s1451_s0 = inlined_call_operand.vmem [shape: f32[200,16], index: 0, kind: input, shape index: {}]   ;;  %s1452_s1 = inlined_call_operand.vmem [shape: f32[16,128], index: 1, kind: input, shape index: {}]   ;;  %s1453_s2 = inlined_call_operand.vmem [shape: f32[1,128], index: 2, kind: input, shape index: {}]   ;;  %s1454_s3 = inlined_call_operand.vmem [shape: f32[128,128], index: 3, kind: input, shape index: {}]   ;;  %s1455_s4 = inlined_call_operand.vmem [shape: f32[1,128], index: 4, kind: input, shape index: {}]   ;;  %s1456_s5 = inlined_call_operand.hbm [shape: f32[200,128], index: 5, kind: output, shape index: {}]  }
   0x1   :  { %v47_v0 = vld [vmem:[%s1452_s1 + $0x8] sm:$0xff]  ;;  %720 = vmatprep.subr.mxu0 %v1065_v1  ;;  %v46_v2 = vld [vmem:[%s1452_s1] sm:$0xff]  ;;  %724 = vmatprep.mubr.msk.f32.mxu0 %vm1066_vm0, %v1065_v1  ;;  %v361_v5 = vld [vmem:[%s1454_s3 + $0x78] sm:$0xff] }
   0x2   :  { %721 = vmatpush3.msra.mxu0 %v47_v0  ;;  %v21_v3 = vld [vmem:[%s1451_s0] sm:$0xff]  ;;  %906 = vmatprep.subr.mxu1 %v1065_v1  ;;  %v22_v4 = vld [vmem:[%s1451_s0 + $0x8] sm:$0xff]  ;;  %v360_v6 = vld [vmem:[%s1454_s3 + $0x70] sm:$0xff] }
   0x3   :  { %722 = vmatprep.subr.mxu0 %v1065_v1  ;;  %840 = vmatprep.mubr.msk.f32.mxu1 %vm1066_vm0, %v1065_v1  ;;  %v23_v7 = vld [vmem:[%s1451_s0 + $0x10] sm:$0xff]  ;;  %v359_v8 = vld [vmem:[%s1454_s3 + $0x68] sm:$0xff] }
   0x4   :  { %723 = vmatpush3.msra.mxu0 %v46_v2  ;;  %922 = vmatpush3.msra.mxu1 %v361_v5 }
   0x5   :  { %725 = vmatmul.mubr.msk.f32.vlgmr.msra.gmra.mxu0 %vm55_vm1, %v21_v3  ;;  %799 = vmatprep.subr.mxu0 %v1065_v1 }
   0x6   :  { %727 = vmatprep.mubr.msk.f32.mxu0 %vm1066_vm0, %v1065_v1  ;;  %800 = vmatpush3.msra.mxu0 %v361_v5 }
   0x7   :  { %801 = vmatprep.subr.mxu0 %v1065_v1 }
   0x9   :  { %728 = vmatmul.mubr.msk.f32.gmra.mxu0 %vm55_vm1, %v22_v4 }
   0xa   :  { %730 = vmatprep.mubr.msk.f32.mxu0 %vm1066_vm0, %v1065_v1 }
   0xb   :  { %10 = vsyncpa [#allocation3], 0  ;;  %802 = vmatpush3.msra.mxu0 %v360_v6  ;;  %907 = vmatprep.subr.mxu1 %v1065_v1  ;;  %v358_v9 = vld [vmem:[%s1454_s3 + $0x60] sm:$0xff]  ;;  %v24_v10 = vld [vmem:[%s1451_s0 + $0x18] sm:$0xff] }
   0xc   :  { %803 = vmatprep.subr.mxu0 %v1065_v1  ;;  %v357_v11 = vld [vmem:[%s1454_s3 + $0x58] sm:$0xff]  ;;  %923 = vmatpush3.msra.mxu1 %v360_v6  ;;  %v356_v12 = vld [vmem:[%s1454_s3 + $0x50] sm:$0xff]  ;;  %v25_v13 = vld [vmem:[%s1451_s0 + $0x20] sm:$0xff] }
   0xd   :  { %731 = vmatmul.mubr.msk.f32.gmra.mxu0 %vm55_vm1, %v23_v7  ;;  %908 = vmatprep.subr.mxu1 %v1065_v1  ;;  %v355_v14 = vld [vmem:[%s1454_s3 + $0x48] sm:$0xff]  ;;  %v27_v16 = vld [vmem:[%s1451_s0 + $0x30] sm:$0xff]  ;;  %v28_v17 = vld [vmem:[%s1451_s0 + $0x38] sm:$0xff] }
   0xe   :  { %733 = vmatprep.mubr.msk.f32.mxu0 %vm1066_vm0, %v1065_v1  ;;  %804 = vmatpush3.msra.mxu0 %v359_v8  ;;  %v26_v15 = vld [vmem:[%s1451_s0 + $0x28] sm:$0xff]  ;;  %v29_v18 = vld [vmem:[%s1451_s0 + $0x40] sm:$0xff]  ;;  %v31_v20 = vld [vmem:[%s1451_s0 + $0x50] sm:$0xff] }
   0xf   :  { %805 = vmatprep.subr.mxu0 %v1065_v1  ;;  %924 = vmatpush3.msra.mxu1 %v359_v8  ;;  %v30_v19 = vld [vmem:[%s1451_s0 + $0x48] sm:$0xff]  ;;  %v32_v21 = vld [vmem:[%s1451_s0 + $0x58] sm:$0xff]  ;;  %v33_v22 = vld [vmem:[%s1451_s0 + $0x60] sm:$0xff] }
  0x10   :  { %806 = vmatpush3.msra.mxu0 %v358_v9  ;;  %909 = vmatprep.subr.mxu1 %v1065_v1  ;;  %v34_v23 = vld [vmem:[%s1451_s0 + $0x68] sm:$0xff]  ;;  %v35_v24 = vld [vmem:[%s1451_s0 + $0x70] sm:$0xff]  ;;  %v36_v25 = vld [vmem:[%s1451_s0 + $0x78] sm:$0xff] }
  0x11   :  { %734 = vmatmul.mubr.msk.f32.gmra.mxu0 %vm55_vm1, %v24_v10  ;;  %807 = vmatprep.subr.mxu0 %v1065_v1  ;;  %v37_v26 = vld [vmem:[%s1451_s0 + $0x80] sm:$0xff]  ;;  %v38_v28 = vld [vmem:[%s1451_s0 + $0x88] sm:$0xff]  ;;  %v353_v29 = vld [vmem:[%s1454_s3 + $0x38] sm:$0xff] }
  0x12   :  { %736 = vmatprep.mubr.msk.f32.mxu0 %vm1066_vm0, %v1065_v1  ;;  %808 = vmatpush3.msra.mxu0 %v357_v11  ;;  %v354_v27 = vld [vmem:[%s1454_s3 + $0x40] sm:$0xff]  ;;  %v352_v30 = vld [vmem:[%s1454_s3 + $0x30] sm:$0xff]  ;;  %v351_v32 = vld [vmem:[%s1454_s3 + $0x28] sm:$0xff] }
  0x13   :  { %809 = vmatprep.subr.mxu0 %v1065_v1  ;;  %925 = vmatpush3.msra.mxu1 %v358_v9  ;;  %v39_v31 = vld [vmem:[%s1451_s0 + $0x90] sm:$0xff]  ;;  %v350_v33 = vld [vmem:[%s1454_s3 + $0x20] sm:$0xff]  ;;  %v40_v34 = vld [vmem:[%s1451_s0 + $0x98] sm:$0xff] }
  0x14   :  { %810 = vmatpush3.msra.mxu0 %v356_v12  ;;  %910 = vmatprep.subr.mxu1 %v1065_v1  ;;  %v349_v35 = vld [vmem:[%s1454_s3 + $0x18] sm:$0xff]  ;;  %v348_v36 = vld [vmem:[%s1454_s3 + $0x10] sm:$0xff]  ;;  %v41_v37 = vld [vmem:[%s1451_s0 + $0xa0] sm:$0xff] }
  0x15   :  { %737 = vmatmul.mubr.msk.f32.gmra.mxu0 %vm55_vm1, %v25_v13  ;;  %811 = vmatprep.subr.mxu0 %v1065_v1  ;;  %v347_v38 = vld [vmem:[%s1454_s3 + $0x8] sm:$0xff]  ;;  %v346_v39 = vld [vmem:[%s1454_s3] sm:$0xff]  ;;  %v43_v41 = vld [vmem:[%s1451_s0 + $0xb0] sm:$0xff] }
  0x16   :  { %739 = vmatprep.mubr.msk.f32.mxu0 %vm1066_vm0, %v1065_v1  ;;  %812 = vmatpush3.msra.mxu0 %v355_v14  ;;  %v42_v40 = vld [vmem:[%s1451_s0 + $0xa8] sm:$0xff]  ;;  %v44_v42 = vld [vmem:[%s1451_s0 + $0xb8] sm:$0xff]  ;;  %v45_v43 = vld [vmem:[%s1451_s0 + $0xc0] sm:$0xff] }
  0x17   :  { %813 = vmatprep.subr.mxu0 %v1065_v1  ;;  %926 = vmatpush3.msra.mxu1 %v357_v11  ;;  %v1345_v44 = vld [vmem:[%s1453_s2] ss:$0 sm:$0xff] }
  0x18   :  { %911 = vmatprep.subr.mxu1 %v1065_v1  ;;  %814 = vmatpush3.msra.mxu0 %v354_v27 }
  0x19   :  { %740 = vmatmul.mubr.msk.f32.gmra.mxu0 %vm55_vm1, %v26_v15  ;;  %927 = vmatpush3.msra.mxu1 %v356_v12 }
  0x1a   :  { %742 = vmatprep.mubr.msk.f32.mxu0 %vm1066_vm0, %v1065_v1  ;;  %912 = vmatprep.subr.mxu1 %v1065_v1 }
  0x1b   :  { %928 = vmatpush3.msra.mxu1 %v355_v14  ;;  %815 = vmatprep.subr.mxu0 %v1065_v1 }
  0x1c   :  { %913 = vmatprep.subr.mxu1 %v1065_v1  ;;  %816 = vmatpush3.msra.mxu0 %v353_v29 }
  0x1d   :  { %743 = vmatmul.mubr.msk.f32.gmra.mxu0 %vm55_vm1, %v27_v16  ;;  %929 = vmatpush3.msra.mxu1 %v354_v27 }
  0x1e   :  { %745 = vmatprep.mubr.msk.f32.mxu0 %vm1066_vm0, %v1065_v1  ;;  %914 = vmatprep.subr.mxu1 %v1065_v1 }
  0x1f   :  { %930 = vmatpush3.msra.mxu1 %v353_v29  ;;  %817 = vmatprep.subr.mxu0 %v1065_v1 }
  0x20   :  { %818 = vmatpush3.msra.mxu0 %v352_v30  ;;  %915 = vmatprep.subr.mxu1 %v1065_v1 }
  0x21   :  { %746 = vmatmul.mubr.msk.f32.gmra.mxu0 %vm55_vm1, %v28_v17  ;;  %819 = vmatprep.subr.mxu0 %v1065_v1 }
  0x22   :  { %748 = vmatprep.mubr.msk.f32.mxu0 %vm1066_vm0, %v1065_v1  ;;  %820 = vmatpush3.msra.mxu0 %v351_v32 }
  0x23   :  { %931 = vmatpush3.msra.mxu1 %v352_v30  ;;  %821 = vmatprep.subr.mxu0 %v1065_v1 }
  0x24   :  { %822 = vmatpush3.msra.mxu0 %v350_v33  ;;  %916 = vmatprep.subr.mxu1 %v1065_v1 }
  0x25   :  { %749 = vmatmul.mubr.msk.f32.gmra.mxu0 %vm55_vm1, %v29_v18  ;;  %823 = vmatprep.subr.mxu0 %v1065_v1 }
  0x26   :  { %751 = vmatprep.mubr.msk.f32.mxu0 %vm1066_vm0, %v1065_v1  ;;  %824 = vmatpush3.msra.mxu0 %v349_v35 }
  0x27   :  { %932 = vmatpush3.msra.mxu1 %v351_v32  ;;  %825 = vmatprep.subr.mxu0 %v1065_v1 }
  0x28   :  { %826 = vmatpush3.msra.mxu0 %v348_v36  ;;  %917 = vmatprep.subr.mxu1 %v1065_v1 }
  0x29   :  { %752 = vmatmul.mubr.msk.f32.gmra.mxu0 %vm55_vm1, %v30_v19  ;;  %827 = vmatprep.subr.mxu0 %v1065_v1 }
  0x2a   :  { %754 = vmatprep.mubr.msk.f32.mxu0 %vm1066_vm0, %v1065_v1  ;;  %828 = vmatpush3.msra.mxu0 %v347_v38 }
  0x2b   :  { %933 = vmatpush3.msra.mxu1 %v350_v33  ;;  %829 = vmatprep.subr.mxu0 %v1065_v1 }
  0x2c   :  { %830 = vmatpush3.msra.mxu0 %v346_v39  ;;  %918 = vmatprep.subr.mxu1 %v1065_v1 }
  0x2d   :  { %755 = vmatmul.mubr.msk.f32.gmra.mxu0 %vm55_vm1, %v31_v20  ;;  %934 = vmatpush3.msra.mxu1 %v349_v35 }
  0x2e   :  { %757 = vmatprep.mubr.msk.f32.mxu0 %vm1066_vm0, %v1065_v1  ;;  %919 = vmatprep.subr.mxu1 %v1065_v1 }
  0x2f   :  { %935 = vmatpush3.msra.mxu1 %v348_v36 }
  0x30   :  { %920 = vmatprep.subr.mxu1 %v1065_v1 }
  0x31   :  { %758 = vmatmul.mubr.msk.f32.gmra.mxu0 %vm55_vm1, %v32_v21  ;;  %936 = vmatpush3.msra.mxu1 %v347_v38 }
  0x32   :  { %760 = vmatprep.mubr.msk.f32.mxu0 %vm1066_vm0, %v1065_v1  ;;  %921 = vmatprep.subr.mxu1 %v1065_v1 }
  0x33   :  { %937 = vmatpush3.msra.mxu1 %v346_v39 }
  0x35   :  { %761 = vmatmul.mubr.msk.f32.gmra.mxu0 %vm55_vm1, %v33_v22 }
  0x36   :  { %763 = vmatprep.mubr.msk.f32.mxu0 %vm1066_vm0, %v1065_v1 }
  0x39   :  { %764 = vmatmul.mubr.msk.f32.gmra.mxu0 %vm55_vm1, %v34_v23 }
  0x3a   :  { %766 = vmatprep.mubr.msk.f32.mxu0 %vm1066_vm0, %v1065_v1 }
  0x3d   :  { %767 = vmatmul.mubr.msk.f32.gmra.mxu0 %vm55_vm1, %v35_v24 }
  0x3e   :  { %769 = vmatprep.mubr.msk.f32.mxu0 %vm1066_vm0, %v1065_v1 }
  0x41   :  { %770 = vmatmul.mubr.msk.f32.gmra.mxu0 %vm55_vm1, %v36_v25 }
  0x42   :  { %772 = vmatprep.mubr.msk.f32.mxu0 %vm1066_vm0, %v1065_v1 }
  0x45   :  { %773 = vmatmul.mubr.msk.f32.gmra.mxu0 %vm55_vm1, %v37_v26 }
  0x46   :  { %775 = vmatprep.mubr.msk.f32.mxu0 %vm1066_vm0, %v1065_v1 }
  0x49   :  { %776 = vmatmul.mubr.msk.f32.gmra.mxu0 %vm55_vm1, %v38_v28 }
  0x4a   :  { %778 = vmatprep.mubr.msk.f32.mxu0 %vm1066_vm0, %v1065_v1 }
  0x4d   :  { %779 = vmatmul.mubr.msk.f32.gmra.mxu0 %vm55_vm1, %v39_v31 }
  0x4e   :  { %781 = vmatprep.mubr.msk.f32.mxu0 %vm1066_vm0, %v1065_v1 }
  0x51   :  { %782 = vmatmul.mubr.msk.f32.gmra.mxu0 %vm55_vm1, %v40_v34 }
  0x52   :  { %784 = vmatprep.mubr.msk.f32.mxu0 %vm1066_vm0, %v1065_v1 }
  0x55   :  { %785 = vmatmul.mubr.msk.f32.gmra.mxu0 %vm55_vm1, %v41_v37 }
  0x56   :  { %787 = vmatprep.mubr.msk.f32.mxu0 %vm1066_vm0, %v1065_v1 }
  0x59   :  { %788 = vmatmul.mubr.msk.f32.gmra.mxu0 %vm55_vm1, %v42_v40 }
  0x5a   :  { %790 = vmatprep.mubr.msk.f32.mxu0 %vm1066_vm0, %v1065_v1 }
  0x5d   :  { %791 = vmatmul.mubr.msk.f32.gmra.mxu0 %vm55_vm1, %v43_v41 }
  0x5e   :  { %793 = vmatprep.mubr.msk.f32.mxu0 %vm1066_vm0, %v1065_v1 }
  0x61   :  { %794 = vmatmul.mubr.msk.f32.gmra.mxu0 %vm55_vm1, %v44_v42 }
  0x62   :  { %796 = vmatprep.mubr.msk.f32.mxu0 %vm1066_vm0, %v1065_v1 }
  0x65   :  { %797 = vmatmul.mubr.msk.f32.gmra.mxu0 %vm55_vm1, %v45_v43 }
  0x66   :  { %831 = vmatprep.mubr.msk.f32.mxu0 %vm1066_vm0, %v1065_v1 }
  0xc5   :  { %v197_v45 = vpop.f32.mrf.mxu0 }
  0xc6   :  { %v198_v46 = vadd.f32 %v1345_v44, %v197_v45 }
  0xc7   :  { %v726_v47 = vpop.f32.mrf.mxu0 }
  0xc8   :  { %943 = vtanh.f32 %v198_v46 }
  0xc9   :  { %v202_v48 = vpop.f32.mrf.mxu0 }
  0xca   :  { %v203_v49 = vadd.f32 %v1345_v44, %v202_v48 }
  0xcb   :  { %v729_v50 = vpop.f32.mrf.mxu0 }
  0xcc   :  { %945 = vtanh.f32 %v203_v49 }
  0xcd   :  { %v207_v51 = vpop.f32.mrf.mxu0 }
  0xce   :  { %v208_v52 = vadd.f32 %v1345_v44, %v207_v51 }
  0xcf   :  { %v732_v53 = vpop.f32.mrf.mxu0 }
  0xd0   :  { %947 = vtanh.f32 %v208_v52 }
  0xd1   :  { %v212_v54 = vpop.f32.mrf.mxu0 }
  0xd2   :  { %v213_v55 = vadd.f32 %v1345_v44, %v212_v54 }
  0xd3   :  { %v735_v56 = vpop.f32.mrf.mxu0 }
  0xd4   :  { %949 = vtanh.f32 %v213_v55 }
  0xd5   :  { %v944_v57 = vpop.eup %943  ;;  %v217_v58 = vpop.f32.mrf.mxu0 }
  0xd6   :  { %v218_v59 = vadd.f32 %v1345_v44, %v217_v58  ;;  %832 = vmatmul.mubr.f32.vlgmr.msra.gmra.mxu0 %v944_v57 }
  0xd7   :  { %v738_v60 = vpop.f32.mrf.mxu0  ;;  %834 = vmatprep.mubr.msk.f32.mxu0 %vm1066_vm0, %v1065_v1 }
  0xd8   :  { %951 = vtanh.f32 %v218_v59 }
  0xd9   :  { %v946_v61 = vpop.eup %945  ;;  %v222_v62 = vpop.f32.mrf.mxu0 }
  0xda   :  { %v223_v63 = vadd.f32 %v1345_v44, %v222_v62  ;;  %835 = vmatmul.mubr.f32.gmra.mxu0 %v946_v61 }
  0xdb   :  { %v741_v0 = vpop.f32.mrf.mxu0  ;;  %837 = vmatprep.mubr.msk.f32.mxu0 %vm1066_vm0, %v1065_v1 }
  0xdc   :  { %953 = vtanh.f32 %v223_v63 }
  0xdd   :  { %v948_v2 = vpop.eup %947  ;;  %v227_v3 = vpop.f32.mrf.mxu0 }
  0xde   :  { %v228_v4 = vadd.f32 %v1345_v44, %v227_v3  ;;  %838 = vmatmul.mubr.f32.gmra.mxu0 %v948_v2 }
  0xdf   :  { %v744_v5 = vpop.f32.mrf.mxu0 }
  0xe0   :  { %955 = vtanh.f32 %v228_v4 }
  0xe1   :  { %v950_v6 = vpop.eup %949  ;;  %v232_v7 = vpop.f32.mrf.mxu0 }
  0xe2   :  { %v233_v8 = vadd.f32 %v1345_v44, %v232_v7  ;;  %841 = vmatmul.mubr.f32.vlgmr.msra.gmra.mxu1 %v950_v6 }
  0xe3   :  { %v747_v9 = vpop.f32.mrf.mxu0  ;;  %843 = vmatprep.mubr.msk.f32.mxu1 %vm1066_vm0, %v1065_v1 }
  0xe4   :  { %957 = vtanh.f32 %v233_v8 }
  0xe5   :  { %v952_v10 = vpop.eup %951  ;;  %v237_v11 = vpop.f32.mrf.mxu0 }
  0xe6   :  { %v238_v12 = vadd.f32 %v1345_v44, %v237_v11  ;;  %844 = vmatmul.mubr.f32.gmra.mxu1 %v952_v10 }
  0xe7   :  { %v750_v13 = vpop.f32.mrf.mxu0  ;;  %846 = vmatprep.mubr.msk.f32.mxu1 %vm1066_vm0, %v1065_v1 }
  0xe8   :  { %959 = vtanh.f32 %v238_v12 }
  0xe9   :  { %v954_v14 = vpop.eup %953  ;;  %v242_v15 = vpop.f32.mrf.mxu0 }
  0xea   :  { %v243_v16 = vadd.f32 %v1345_v44, %v242_v15  ;;  %847 = vmatmul.mubr.f32.gmra.mxu1 %v954_v14 }
  0xeb   :  { %v753_v17 = vpop.f32.mrf.mxu0  ;;  %849 = vmatprep.mubr.msk.f32.mxu1 %vm1066_vm0, %v1065_v1 }
  0xec   :  { %961 = vtanh.f32 %v243_v16 }
  0xed   :  { %v956_v18 = vpop.eup %955  ;;  %v247_v19 = vpop.f32.mrf.mxu0 }
  0xee   :  { %v248_v20 = vadd.f32 %v1345_v44, %v247_v19  ;;  %850 = vmatmul.mubr.f32.gmra.mxu1 %v956_v18  ;;  %v1421_v19 = vld [vmem:[%s1455_s4] ss:$0 sm:$0xff]  ;;  %s1067_s4 = smov [#allocation2]  }
  0xef   :  { %v756_v21 = vpop.f32.mrf.mxu0  ;;  %852 = vmatprep.mubr.msk.f32.mxu1 %vm1066_vm0, %v1065_v1  ;;  %s614_s26 = sshll.u32 %s1067_s4, 4  ;;  %s615_s26 = int_to_ptr.vmem [resolvable:$true] %s614_s26 }
  0xf0   :  { %963 = vtanh.f32 %v248_v20  ;;  %s1043_s27 = scalar_lea.vmem %s615_s26, 3200  ;;  %p1048_p1 = scmp.lt.s32.totalorder %s615_s26, %s615_s26 }
  0xf1   :  { %v958_v22 = vpop.eup %957  ;;  %v252_v23 = vpop.f32.mrf.mxu0  ;;  %p1044_p0 = scmp.ne.s32.totalorder %s615_s26, %s1043_s27  ;;  %p1049_p2 = scmp.lt.s32.totalorder %s1043_s27, %s1043_s27 }
  0xf2   :  { %v253_v24 = vadd.f32 %v1345_v44, %v252_v23  ;;  %853 = vmatmul.mubr.f32.gmra.mxu1 %v958_v22 }
  0xf3   :  { %v759_v25 = vpop.f32.mrf.mxu0  ;;  %855 = vmatprep.mubr.msk.f32.mxu1 %vm1066_vm0, %v1065_v1  ;;  %p1050_p3 = por %p1049_p2, %p1048_p1 }
  0xf4   :  { %965 = vtanh.f32 %v253_v24 }
  0xf5   :  { %v960_v26 = vpop.eup %959  ;;  %v257_v27 = vpop.f32.mrf.mxu0  ;;  %p1051_p4 = pnand %p1050_p3, %p1044_p0 }
  0xf6   :  { %v258_v28 = vadd.f32 %v1345_v44, %v257_v27  ;;  %856 = vmatmul.mubr.f32.gmra.mxu1 %v960_v26 }
  0xf7   :  { %v762_v29 = vpop.f32.mrf.mxu0  ;;  %858 = vmatprep.mubr.msk.f32.mxu1 %vm1066_vm0, %v1065_v1 }
  0xf8   :  { %967 = vtanh.f32 %v258_v28 }
  0xf9   :  { %v962_v30 = vpop.eup %961  ;;  %v262_v31 = vpop.f32.mrf.mxu0 }
  0xfa   :  { %v263_v32 = vadd.f32 %v1345_v44, %v262_v31  ;;  %859 = vmatmul.mubr.f32.gmra.mxu1 %v962_v30 }
  0xfb   :  { %v765_v33 = vpop.f32.mrf.mxu0  ;;  %861 = vmatprep.mubr.msk.f32.mxu1 %vm1066_vm0, %v1065_v1 }
  0xfc   :  { %969 = vtanh.f32 %v263_v32 }
  0xfd   :  { %v964_v34 = vpop.eup %963  ;;  %v267_v35 = vpop.f32.mrf.mxu0 }
  0xfe   :  { %v268_v36 = vadd.f32 %v1345_v44, %v267_v35  ;;  %862 = vmatmul.mubr.f32.gmra.mxu1 %v964_v34 }
  0xff   :  { %v768_v37 = vpop.f32.mrf.mxu0  ;;  %864 = vmatprep.mubr.msk.f32.mxu1 %vm1066_vm0, %v1065_v1 }
 0x100   :  { %971 = vtanh.f32 %v268_v36 }
 0x101   :  { %v966_v38 = vpop.eup %965  ;;  %v272_v39 = vpop.f32.mrf.mxu0 }
 0x102   :  { %v273_v40 = vadd.f32 %v1345_v44, %v272_v39  ;;  %865 = vmatmul.mubr.f32.gmra.mxu1 %v966_v38 }
 0x103   :  { %v771_v41 = vpop.f32.mrf.mxu0  ;;  %867 = vmatprep.mubr.msk.f32.mxu1 %vm1066_vm0, %v1065_v1 }
 0x104   :  { %973 = vtanh.f32 %v273_v40 }
 0x105   :  { %v968_v42 = vpop.eup %967  ;;  %v277_v43 = vpop.f32.mrf.mxu0 }
 0x106   :  { %v278_v45 = vadd.f32 %v1345_v44, %v277_v43  ;;  %868 = vmatmul.mubr.f32.gmra.mxu1 %v968_v42 }
 0x107   :  { %v774_v46 = vpop.f32.mrf.mxu0  ;;  %870 = vmatprep.mubr.msk.f32.mxu1 %vm1066_vm0, %v1065_v1 }
 0x108   :  { %975 = vtanh.f32 %v278_v45 }
 0x109   :  { %v970_v47 = vpop.eup %969  ;;  %v282_v48 = vpop.f32.mrf.mxu0 }
 0x10a   :  { %v283_v49 = vadd.f32 %v1345_v44, %v282_v48  ;;  %871 = vmatmul.mubr.f32.gmra.mxu1 %v970_v47 }
 0x10b   :  { %v777_v50 = vpop.f32.mrf.mxu0  ;;  %873 = vmatprep.mubr.msk.f32.mxu1 %vm1066_vm0, %v1065_v1 }
 0x10c   :  { %977 = vtanh.f32 %v283_v49 }
 0x10d   :  { %v972_v51 = vpop.eup %971  ;;  %v287_v52 = vpop.f32.mrf.mxu0 }
 0x10e   :  { %v288_v53 = vadd.f32 %v1345_v44, %v287_v52  ;;  %874 = vmatmul.mubr.f32.gmra.mxu1 %v972_v51 }
 0x10f   :  { %v780_v54 = vpop.f32.mrf.mxu0  ;;  %876 = vmatprep.mubr.msk.f32.mxu1 %vm1066_vm0, %v1065_v1 }
 0x110   :  { %979 = vtanh.f32 %v288_v53 }
 0x111   :  { %v974_v55 = vpop.eup %973  ;;  %v292_v56 = vpop.f32.mrf.mxu0 }
 0x112   :  { %v293_v57 = vadd.f32 %v1345_v44, %v292_v56  ;;  %877 = vmatmul.mubr.f32.gmra.mxu1 %v974_v55 }
 0x113   :  { %v783_v58 = vpop.f32.mrf.mxu0  ;;  %879 = vmatprep.mubr.msk.f32.mxu1 %vm1066_vm0, %v1065_v1 }
 0x114   :  { %981 = vtanh.f32 %v293_v57 }
 0x115   :  { %v976_v59 = vpop.eup %975  ;;  %v297_v60 = vpop.f32.mrf.mxu0 }
 0x116   :  { %v298_v61 = vadd.f32 %v1345_v44, %v297_v60  ;;  %880 = vmatmul.mubr.f32.gmra.mxu1 %v976_v59 }
 0x117   :  { %v786_v62 = vpop.f32.mrf.mxu0  ;;  %882 = vmatprep.mubr.msk.f32.mxu1 %vm1066_vm0, %v1065_v1 }
 0x118   :  { %983 = vtanh.f32 %v298_v61 }
 0x119   :  { %v978_v63 = vpop.eup %977  ;;  %v302_v0 = vpop.f32.mrf.mxu0 }
 0x11a   :  { %v303_v2 = vadd.f32 %v1345_v44, %v302_v0  ;;  %883 = vmatmul.mubr.f32.gmra.mxu1 %v978_v63 }
 0x11b   :  { %v789_v3 = vpop.f32.mrf.mxu0  ;;  %885 = vmatprep.mubr.msk.f32.mxu1 %vm1066_vm0, %v1065_v1 }
 0x11c   :  { %985 = vtanh.f32 %v303_v2 }
 0x11d   :  { %v980_v4 = vpop.eup %979  ;;  %v307_v5 = vpop.f32.mrf.mxu0 }
 0x11e   :  { %v308_v6 = vadd.f32 %v1345_v44, %v307_v5  ;;  %886 = vmatmul.mubr.f32.gmra.mxu1 %v980_v4 }
 0x11f   :  { %v792_v7 = vpop.f32.mrf.mxu0  ;;  %888 = vmatprep.mubr.msk.f32.mxu1 %vm1066_vm0, %v1065_v1 }
 0x120   :  { %987 = vtanh.f32 %v308_v6 }
 0x121   :  { %v982_v8 = vpop.eup %981  ;;  %v312_v9 = vpop.f32.mrf.mxu0 }
 0x122   :  { %v313_v10 = vadd.f32 %v1345_v44, %v312_v9  ;;  %889 = vmatmul.mubr.f32.gmra.mxu1 %v982_v8 }
 0x123   :  { %v795_v11 = vpop.f32.mrf.mxu0  ;;  %891 = vmatprep.mubr.msk.f32.mxu1 %vm1066_vm0, %v1065_v1 }
 0x124   :  { %989 = vtanh.f32 %v313_v10 }
 0x125   :  { %v984_v12 = vpop.eup %983  ;;  %v317_v13 = vpop.f32.mrf.mxu0 }
 0x126   :  { %v318_v14 = vadd.f32 %v1345_v44, %v317_v13  ;;  %892 = vmatmul.mubr.f32.gmra.mxu1 %v984_v12 }
 0x127   :  { %v798_v15 = vpop.f32.mrf.mxu0  ;;  %894 = vmatprep.mubr.msk.f32.mxu1 %vm1066_vm0, %v1065_v1 }
 0x128   :  { %991 = vtanh.f32 %v318_v14 }
 0x129   :  { %v986_v16 = vpop.eup %985 }
 0x12a   :  { %895 = vmatmul.mubr.f32.gmra.mxu1 %v986_v16 }
 0x12b   :  { %897 = vmatprep.mubr.msk.f32.mxu1 %vm1066_vm0, %v1065_v1 }
 0x12d   :  { %v988_v17 = vpop.eup %987 }
 0x12e   :  { %898 = vmatmul.mubr.f32.gmra.mxu1 %v988_v17 }
 0x12f   :  { %900 = vmatprep.mubr.msk.f32.mxu1 %vm1066_vm0, %v1065_v1 }
 0x131   :  { %v990_v18 = vpop.eup %989 }
 0x132   :  { %901 = vmatmul.mubr.f32.gmra.mxu1 %v990_v18 }
 0x133   :  { %903 = vmatprep.mubr.msk.f32.mxu1 %vm1066_vm0, %v1065_v1 }
 0x135   :  { %v992_v44 = vpop.eup %991 }
 0x136   :  { %904 = vmatmul.mubr.f32.gmra.mxu1 %v992_v44 }
 0x196   :  { %v435_v20 = vpop.f32.mrf.mxu0 }
 0x197   :  { %v436_v21 = vadd.f32 %v1421_v19, %v435_v20 }
 0x198   :  { %v833_v22 = vpop.f32.mrf.mxu0 }
 0x199   :  { %993 = vtanh.f32 %v436_v21 }
 0x19a   :  { %v440_v23 = vpop.f32.mrf.mxu0 }
 0x19b   :  { %v441_v24 = vadd.f32 %v1421_v19, %v440_v23 }
 0x19c   :  { %v836_v25 = vpop.f32.mrf.mxu0 }
 0x19d   :  { %995 = vtanh.f32 %v441_v24 }
 0x19e   :  { %v445_v26 = vpop.f32.mrf.mxu0 }
 0x19f   :  { %v446_v1 = vadd.f32 %v1421_v19, %v445_v26 }
 0x1a0   :  { %v839_v27 = vpop.f32.mrf.mxu0 }
 0x1a1   :  { %997 = vtanh.f32 %v446_v1 }
 0x1a2   :  { %v450_v28 = vpop.f32.mrf.mxu1 }
 0x1a3   :  { %v451_v29 = vadd.f32 %v1421_v19, %v450_v28 }
 0x1a4   :  { %v842_v30 = vpop.f32.mrf.mxu1 }
 0x1a5   :  { %999 = vtanh.f32 %v451_v29 }
 0x1a6   :  { %v994_v31 = vpop.eup %993  ;;  %v455_v32 = vpop.f32.mrf.mxu1 }
 0x1a7   :  { %584 = vst [vmem:[#allocation2] sm:$0xff] %v994_v31  ;;  %v456_v33 = vadd.f32 %v1421_v19, %v455_v32 }
 0x1a8   :  { %v845_v34 = vpop.f32.mrf.mxu1 }
 0x1a9   :  { %1001 = vtanh.f32 %v456_v33 }
 0x1aa   :  { %v996_v35 = vpop.eup %995  ;;  %v460_v36 = vpop.f32.mrf.mxu1 }
 0x1ab   :  { %585 = vst [vmem:[#allocation2 + $0x8] sm:$0xff] %v996_v35  ;;  %v461_v37 = vadd.f32 %v1421_v19, %v460_v36 }
 0x1ac   :  { %v848_v38 = vpop.f32.mrf.mxu1 }
 0x1ad   :  { %1003 = vtanh.f32 %v461_v37 }
 0x1ae   :  { %v998_v39 = vpop.eup %997  ;;  %v465_v40 = vpop.f32.mrf.mxu1 }
 0x1af   :  { %586 = vst [vmem:[#allocation2 + $0x10] sm:$0xff] %v998_v39  ;;  %v466_v41 = vadd.f32 %v1421_v19, %v465_v40 }
 0x1b0   :  { %v851_v42 = vpop.f32.mrf.mxu1 }
 0x1b1   :  { %1005 = vtanh.f32 %v466_v41 }
 0x1b2   :  { %v1000_v43 = vpop.eup %999  ;;  %v470_v45 = vpop.f32.mrf.mxu1 }
 0x1b3   :  { %587 = vst [vmem:[#allocation2 + $0x18] sm:$0xff] %v1000_v43  ;;  %v471_v46 = vadd.f32 %v1421_v19, %v470_v45 }
 0x1b4   :  { %v854_v47 = vpop.f32.mrf.mxu1 }
 0x1b5   :  { %1007 = vtanh.f32 %v471_v46 }
 0x1b6   :  { %v1002_v48 = vpop.eup %1001  ;;  %v475_v49 = vpop.f32.mrf.mxu1 }
 0x1b7   :  { %588 = vst [vmem:[#allocation2 + $0x20] sm:$0xff] %v1002_v48  ;;  %v476_v50 = vadd.f32 %v1421_v19, %v475_v49 }
 0x1b8   :  { %v857_v51 = vpop.f32.mrf.mxu1 }
 0x1b9   :  { %1009 = vtanh.f32 %v476_v50 }
 0x1ba   :  { %v1004_v52 = vpop.eup %1003  ;;  %v480_v53 = vpop.f32.mrf.mxu1 }
 0x1bb   :  { %589 = vst [vmem:[#allocation2 + $0x28] sm:$0xff] %v1004_v52  ;;  %v481_v54 = vadd.f32 %v1421_v19, %v480_v53 }
 0x1bc   :  { %v860_v55 = vpop.f32.mrf.mxu1 }
 0x1bd   :  { %1011 = vtanh.f32 %v481_v54 }
 0x1be   :  { %v1006_v56 = vpop.eup %1005  ;;  %v485_v57 = vpop.f32.mrf.mxu1 }
 0x1bf   :  { %590 = vst [vmem:[#allocation2 + $0x30] sm:$0xff] %v1006_v56  ;;  %v486_v58 = vadd.f32 %v1421_v19, %v485_v57 }
 0x1c0   :  { %v863_v59 = vpop.f32.mrf.mxu1 }
 0x1c1   :  { %1013 = vtanh.f32 %v486_v58 }
 0x1c2   :  { %v1008_v60 = vpop.eup %1007  ;;  %v490_v61 = vpop.f32.mrf.mxu1 }
 0x1c3   :  { %591 = vst [vmem:[#allocation2 + $0x38] sm:$0xff] %v1008_v60  ;;  %v491_v62 = vadd.f32 %v1421_v19, %v490_v61 }
 0x1c4   :  { %v866_v63 = vpop.f32.mrf.mxu1 }
 0x1c5   :  { %1015 = vtanh.f32 %v491_v62 }
 0x1c6   :  { %v1010_v0 = vpop.eup %1009  ;;  %v495_v2 = vpop.f32.mrf.mxu1 }
 0x1c7   :  { %592 = vst [vmem:[#allocation2 + $0x40] sm:$0xff] %v1010_v0  ;;  %v496_v3 = vadd.f32 %v1421_v19, %v495_v2 }
 0x1c8   :  { %v869_v4 = vpop.f32.mrf.mxu1 }
 0x1c9   :  { %1017 = vtanh.f32 %v496_v3 }
 0x1ca   :  { %v1012_v5 = vpop.eup %1011  ;;  %v500_v6 = vpop.f32.mrf.mxu1 }
 0x1cb   :  { %593 = vst [vmem:[#allocation2 + $0x48] sm:$0xff] %v1012_v5  ;;  %v501_v7 = vadd.f32 %v1421_v19, %v500_v6 }
 0x1cc   :  { %v872_v8 = vpop.f32.mrf.mxu1 }
 0x1cd   :  { %1019 = vtanh.f32 %v501_v7 }
 0x1ce   :  { %v1014_v9 = vpop.eup %1013  ;;  %v505_v10 = vpop.f32.mrf.mxu1 }
 0x1cf   :  { %594 = vst [vmem:[#allocation2 + $0x50] sm:$0xff] %v1014_v9  ;;  %v506_v11 = vadd.f32 %v1421_v19, %v505_v10 }
 0x1d0   :  { %v875_v12 = vpop.f32.mrf.mxu1 }
 0x1d1   :  { %1021 = vtanh.f32 %v506_v11 }
 0x1d2   :  { %v1016_v13 = vpop.eup %1015  ;;  %v510_v14 = vpop.f32.mrf.mxu1 }
 0x1d3   :  { %595 = vst [vmem:[#allocation2 + $0x58] sm:$0xff] %v1016_v13  ;;  %v511_v15 = vadd.f32 %v1421_v19, %v510_v14 }
 0x1d4   :  { %v878_v16 = vpop.f32.mrf.mxu1 }
 0x1d5   :  { %1023 = vtanh.f32 %v511_v15 }
 0x1d6   :  { %v1018_v17 = vpop.eup %1017  ;;  %v515_v18 = vpop.f32.mrf.mxu1 }
 0x1d7   :  { %596 = vst [vmem:[#allocation2 + $0x60] sm:$0xff] %v1018_v17  ;;  %v516_v44 = vadd.f32 %v1421_v19, %v515_v18 }
 0x1d8   :  { %v881_v20 = vpop.f32.mrf.mxu1 }
 0x1d9   :  { %1025 = vtanh.f32 %v516_v44 }
 0x1da   :  { %v1020_v21 = vpop.eup %1019  ;;  %v520_v22 = vpop.f32.mrf.mxu1 }
 0x1db   :  { %597 = vst [vmem:[#allocation2 + $0x68] sm:$0xff] %v1020_v21  ;;  %v521_v23 = vadd.f32 %v1421_v19, %v520_v22 }
 0x1dc   :  { %v884_v24 = vpop.f32.mrf.mxu1 }
 0x1dd   :  { %1027 = vtanh.f32 %v521_v23 }
 0x1de   :  { %v1022_v25 = vpop.eup %1021  ;;  %v525_v26 = vpop.f32.mrf.mxu1 }
 0x1df   :  { %598 = vst [vmem:[#allocation2 + $0x70] sm:$0xff] %v1022_v25  ;;  %v526_v1 = vadd.f32 %v1421_v19, %v525_v26 }
 0x1e0   :  { %v887_v27 = vpop.f32.mrf.mxu1 }
 0x1e1   :  { %1029 = vtanh.f32 %v526_v1 }
 0x1e2   :  { %v1024_v28 = vpop.eup %1023  ;;  %v530_v29 = vpop.f32.mrf.mxu1 }
 0x1e3   :  { %599 = vst [vmem:[#allocation2 + $0x78] sm:$0xff] %v1024_v28  ;;  %v531_v30 = vadd.f32 %v1421_v19, %v530_v29 }
 0x1e4   :  { %v890_v31 = vpop.f32.mrf.mxu1 }
 0x1e5   :  { %1031 = vtanh.f32 %v531_v30 }
 0x1e6   :  { %v1026_v32 = vpop.eup %1025  ;;  %v535_v33 = vpop.f32.mrf.mxu1 }
 0x1e7   :  { %600 = vst [vmem:[#allocation2 + $0x80] sm:$0xff] %v1026_v32  ;;  %v536_v34 = vadd.f32 %v1421_v19, %v535_v33 }
 0x1e8   :  { %v893_v35 = vpop.f32.mrf.mxu1 }
 0x1e9   :  { %1033 = vtanh.f32 %v536_v34 }
 0x1ea   :  { %v1028_v36 = vpop.eup %1027  ;;  %v540_v37 = vpop.f32.mrf.mxu1 }
 0x1eb   :  { %601 = vst [vmem:[#allocation2 + $0x88] sm:$0xff] %v1028_v36  ;;  %v541_v38 = vadd.f32 %v1421_v19, %v540_v37 }
 0x1ec   :  { %v896_v39 = vpop.f32.mrf.mxu1 }
 0x1ed   :  { %1035 = vtanh.f32 %v541_v38 }
 0x1ee   :  { %v1030_v40 = vpop.eup %1029  ;;  %v545_v41 = vpop.f32.mrf.mxu1 }
 0x1ef   :  { %602 = vst [vmem:[#allocation2 + $0x90] sm:$0xff] %v1030_v40  ;;  %v546_v42 = vadd.f32 %v1421_v19, %v545_v41 }
 0x1f0   :  { %v899_v43 = vpop.f32.mrf.mxu1 }
 0x1f1   :  { %1037 = vtanh.f32 %v546_v42 }
 0x1f2   :  { %v1032_v45 = vpop.eup %1031  ;;  %v550_v46 = vpop.f32.mrf.mxu1 }
 0x1f3   :  { %603 = vst [vmem:[#allocation2 + $0x98] sm:$0xff] %v1032_v45  ;;  %v551_v47 = vadd.f32 %v1421_v19, %v550_v46 }
 0x1f4   :  { %v902_v48 = vpop.f32.mrf.mxu1 }
 0x1f5   :  { %1039 = vtanh.f32 %v551_v47 }
 0x1f6   :  { %v1034_v49 = vpop.eup %1033  ;;  %v555_v50 = vpop.f32.mrf.mxu1 }
 0x1f7   :  { %604 = vst [vmem:[#allocation2 + $0xa0] sm:$0xff] %v1034_v49  ;;  %v556_v51 = vadd.f32 %v1421_v19, %v555_v50 }
 0x1f8   :  { %v905_v52 = vpop.f32.mrf.mxu1 }
 0x1f9   :  { %1041 = vtanh.f32 %v556_v51 }
 0x1fa   :  { %v1036_v53 = vpop.eup %1035 }
 0x1fb   :  { %605 = vst [vmem:[#allocation2 + $0xa8] sm:$0xff] %v1036_v53 }
 0x1fe   :  { %v1038_v54 = vpop.eup %1037 }
 0x1ff   :  { %606 = vst [vmem:[#allocation2 + $0xb0] sm:$0xff] %v1038_v54 }
 0x202   :  { %v1040_v55 = vpop.eup %1039 }
 0x203   :  { %607 = vst [vmem:[#allocation2 + $0xb8] sm:$0xff] %v1040_v55 }
 0x206   :  { %v1042_v56 = vpop.eup %1041 }
 0x207   :  { %608 = vst [vmem:[#allocation2 + $0xc0] sm:$0xff] %v1042_v56 }
 0x208   :  { %1054 = shalt.err (!%p1051_p4)
}
 0x209   :  { %s1068_s28 = smov 128   ;;  %s1069_s29 = smov 8  }
 0x20a   :  { %620 = dma.vmem_to_hbm [thread:$0]  %s615_s26, 3200, %s1456_s5, [#allocation3], %s1068_s28, %s1068_s28, %s1069_s29  }
 0x20b   :  { %1063 = dma.done.wait [#allocation3], 3200  }
 0x20c   :  { %1064 = vsyncadd [#allocation3], 4294964096 }
 0x20d   :  { %624 = vsyncpa [#allocation3], 1 }

// kernel: tpu_custom_call.1
= control target key start
LH: loop header
LB: loop body
LE: loop exit
PB: predicated region body
PF: predicated region fallthrough
CT: control target
= control target key end

     0   :  { %v1065_v1 = vmov 0.0   ;;  %vm1066_vm0 = vmmov 0   ;;  %vm55_vm1 = vcmask 130048   ;;  %s1451_s0 = inlined_call_operand.vmem [shape: f32[200,16], index: 0, kind: input, shape index: {}]   ;;  %s1452_s1 = inlined_call_operand.vmem [shape: f32[16,128], index: 1, kind: input, shape index: {}]   ;;  %s1453_s2 = inlined_call_operand.vmem [shape: f32[1,128], index: 2, kind: input, shape index: {}]   ;;  %s1454_s3 = inlined_call_operand.vmem [shape: f32[128,128], index: 3, kind: input, shape index: {}]   ;;  %s1455_s4 = inlined_call_operand.vmem [shape: f32[1,128], index: 4, kind: input, shape index: {}]   ;;  %s1456_s5 = inlined_call_operand.hbm [shape: f32[200,128], index: 5, kind: output, shape index: {}]  }
   0x1   :  { %v47_v0 = vld [vmem:[%s1452_s1 + $0x8] sm:$0xff]  ;;  %720 = vmatprep.subr.mxu0 %v1065_v1  ;;  %v46_v2 = vld [vmem:[%s1452_s1] sm:$0xff]  ;;  %724 = vmatprep.mubr.msk.f32.mxu0 %vm1066_vm0, %v1065_v1  ;;  %v361_v5 = vld [vmem:[%s1454_s3 + $0x78] sm:$0xff] }
   0x2   :  { %721 = vmatpush3.msra.mxu0 %v47_v0  ;;  %v21_v3 = vld [vmem:[%s1451_s0] sm:$0xff]  ;;  %906 = vmatprep.subr.mxu1 %v1065_v1  ;;  %v22_v4 = vld [vmem:[%s1451_s0 + $0x8] sm:$0xff]  ;;  %v360_v6 = vld [vmem:[%s1454_s3 + $0x70] sm:$0xff] }
   0x3   :  { %722 = vmatprep.subr.mxu0 %v1065_v1  ;;  %840 = vmatprep.mubr.msk.f32.mxu1 %vm1066_vm0, %v1065_v1  ;;  %v23_v7 = vld [vmem:[%s1451_s0 + $0x10] sm:$0xff]  ;;  %v359_v8 = vld [vmem:[%s1454_s3 + $0x68] sm:$0xff] }
   0x4   :  { %723 = vmatpush3.msra.mxu0 %v46_v2  ;;  %922 = vmatpush3.msra.mxu1 %v361_v5 }
   0x5   :  { %725 = vmatmul.mubr.msk.f32.vlgmr.msra.gmra.mxu0 %vm55_vm1, %v21_v3  ;;  %799 = vmatprep.subr.mxu0 %v1065_v1 }
   0x6   :  { %727 = vmatprep.mubr.msk.f32.mxu0 %vm1066_vm0, %v1065_v1  ;;  %800 = vmatpush3.msra.mxu0 %v361_v5 }
   0x7   :  { %801 = vmatprep.subr.mxu0 %v1065_v1 }
   0x9   :  { %728 = vmatmul.mubr.msk.f32.gmra.mxu0 %vm55_vm1, %v22_v4 }
   0xa   :  { %730 = vmatprep.mubr.msk.f32.mxu0 %vm1066_vm0, %v1065_v1 }
   0xb   :  { %10 = vsyncpa [#allocation3], 0  ;;  %802 = vmatpush3.msra.mxu0 %v360_v6  ;;  %907 = vmatprep.subr.mxu1 %v1065_v1  ;;  %v358_v9 = vld [vmem:[%s1454_s3 + $0x60] sm:$0xff]  ;;  %v24_v10 = vld [vmem:[%s1451_s0 + $0x18] sm:$0xff] }
   0xc   :  { %803 = vmatprep.subr.mxu0 %v1065_v1  ;;  %v357_v11 = vld [vmem:[%s1454_s3 + $0x58] sm:$0xff]  ;;  %923 = vmatpush3.msra.mxu1 %v360_v6  ;;  %v356_v12 = vld [vmem:[%s1454_s3 + $0x50] sm:$0xff]  ;;  %v25_v13 = vld [vmem:[%s1451_s0 + $0x20] sm:$0xff] }
   0xd   :  { %731 = vmatmul.mubr.msk.f32.gmra.mxu0 %vm55_vm1, %v23_v7  ;;  %908 = vmatprep.subr.mxu1 %v1065_v1  ;;  %v355_v14 = vld [vmem:[%s1454_s3 + $0x48] sm:$0xff]  ;;  %v27_v16 = vld [vmem:[%s1451_s0 + $0x30] sm:$0xff]  ;;  %v28_v17 = vld [vmem:[%s1451_s0 + $0x38] sm:$0xff] }
   0xe   :  { %733 = vmatprep.mubr.msk.f32.mxu0 %vm1066_vm0, %v1065_v1  ;;  %804 = vmatpush3.msra.mxu0 %v359_v8  ;;  %v26_v15 = vld [vmem:[%s1451_s0 + $0x28] sm:$0xff]  ;;  %v29_v18 = vld [vmem:[%s1451_s0 + $0x40] sm:$0xff]  ;;  %v31_v20 = vld [vmem:[%s1451_s0 + $0x50] sm:$0xff] }
   0xf   :  { %805 = vmatprep.subr.mxu0 %v1065_v1  ;;  %924 = vmatpush3.msra.mxu1 %v359_v8  ;;  %v30_v19 = vld [vmem:[%s1451_s0 + $0x48] sm:$0xff]  ;;  %v32_v21 = vld [vmem:[%s1451_s0 + $0x58] sm:$0xff]  ;;  %v33_v22 = vld [vmem:[%s1451_s0 + $0x60] sm:$0xff] }
  0x10   :  { %806 = vmatpush3.msra.mxu0 %v358_v9  ;;  %909 = vmatprep.subr.mxu1 %v1065_v1  ;;  %v34_v23 = vld [vmem:[%s1451_s0 + $0x68] sm:$0xff]  ;;  %v35_v24 = vld [vmem:[%s1451_s0 + $0x70] sm:$0xff]  ;;  %v36_v25 = vld [vmem:[%s1451_s0 + $0x78] sm:$0xff] }
  0x11   :  { %734 = vmatmul.mubr.msk.f32.gmra.mxu0 %vm55_vm1, %v24_v10  ;;  %807 = vmatprep.subr.mxu0 %v1065_v1  ;;  %v37_v26 = vld [vmem:[%s1451_s0 + $0x80] sm:$0xff]  ;;  %v38_v28 = vld [vmem:[%s1451_s0 + $0x88] sm:$0xff]  ;;  %v353_v29 = vld [vmem:[%s1454_s3 + $0x38] sm:$0xff] }
  0x12   :  { %736 = vmatprep.mubr.msk.f32.mxu0 %vm1066_vm0, %v1065_v1  ;;  %808 = vmatpush3.msra.mxu0 %v357_v11  ;;  %v354_v27 = vld [vmem:[%s1454_s3 + $0x40] sm:$0xff]  ;;  %v352_v30 = vld [vmem:[%s1454_s3 + $0x30] sm:$0xff]  ;;  %v351_v32 = vld [vmem:[%s1454_s3 + $0x28] sm:$0xff] }
  0x13   :  { %809 = vmatprep.subr.mxu0 %v1065_v1  ;;  %925 = vmatpush3.msra.mxu1 %v358_v9  ;;  %v39_v31 = vld [vmem:[%s1451_s0 + $0x90] sm:$0xff]  ;;  %v350_v33 = vld [vmem:[%s1454_s3 + $0x20] sm:$0xff]  ;;  %v40_v34 = vld [vmem:[%s1451_s0 + $0x98] sm:$0xff] }
  0x14   :  { %810 = vmatpush3.msra.mxu0 %v356_v12  ;;  %910 = vmatprep.subr.mxu1 %v1065_v1  ;;  %v349_v35 = vld [vmem:[%s1454_s3 + $0x18] sm:$0xff]  ;;  %v348_v36 = vld [vmem:[%s1454_s3 + $0x10] sm:$0xff]  ;;  %v41_v37 = vld [vmem:[%s1451_s0 + $0xa0] sm:$0xff] }
  0x15   :  { %737 = vmatmul.mubr.msk.f32.gmra.mxu0 %vm55_vm1, %v25_v13  ;;  %811 = vmatprep.subr.mxu0 %v1065_v1  ;;  %v347_v38 = vld [vmem:[%s1454_s3 + $0x8] sm:$0xff]  ;;  %v346_v39 = vld [vmem:[%s1454_s3] sm:$0xff]  ;;  %v43_v41 = vld [vmem:[%s1451_s0 + $0xb0] sm:$0xff] }
  0x16   :  { %739 = vmatprep.mubr.msk.f32.mxu0 %vm1066_vm0, %v1065_v1  ;;  %812 = vmatpush3.msra.mxu0 %v355_v14  ;;  %v42_v40 = vld [vmem:[%s1451_s0 + $0xa8] sm:$0xff]  ;;  %v44_v42 = vld [vmem:[%s1451_s0 + $0xb8] sm:$0xff]  ;;  %v45_v43 = vld [vmem:[%s1451_s0 + $0xc0] sm:$0xff] }
  0x17   :  { %813 = vmatprep.subr.mxu0 %v1065_v1  ;;  %926 = vmatpush3.msra.mxu1 %v357_v11  ;;  %v1345_v44 = vld [vmem:[%s1453_s2] ss:$0 sm:$0xff] }
  0x18   :  { %911 = vmatprep.subr.mxu1 %v1065_v1  ;;  %814 = vmatpush3.msra.mxu0 %v354_v27 }
  0x19   :  { %740 = vmatmul.mubr.msk.f32.gmra.mxu0 %vm55_vm1, %v26_v15  ;;  %927 = vmatpush3.msra.mxu1 %v356_v12 }
  0x1a   :  { %742 = vmatprep.mubr.msk.f32.mxu0 %vm1066_vm0, %v1065_v1  ;;  %912 = vmatprep.subr.mxu1 %v1065_v1 }
  0x1b   :  { %928 = vmatpush3.msra.mxu1 %v355_v14  ;;  %815 = vmatprep.subr.mxu0 %v1065_v1 }
  0x1c   :  { %913 = vmatprep.subr.mxu1 %v1065_v1  ;;  %816 = vmatpush3.msra.mxu0 %v353_v29 }
  0x1d   :  { %743 = vmatmul.mubr.msk.f32.gmra.mxu0 %vm55_vm1, %v27_v16  ;;  %929 = vmatpush3.msra.mxu1 %v354_v27 }
  0x1e   :  { %745 = vmatprep.mubr.msk.f32.mxu0 %vm1066_vm0, %v1065_v1  ;;  %914 = vmatprep.subr.mxu1 %v1065_v1 }
  0x1f   :  { %930 = vmatpush3.msra.mxu1 %v353_v29  ;;  %817 = vmatprep.subr.mxu0 %v1065_v1 }
  0x20   :  { %818 = vmatpush3.msra.mxu0 %v352_v30  ;;  %915 = vmatprep.subr.mxu1 %v1065_v1 }
  0x21   :  { %746 = vmatmul.mubr.msk.f32.gmra.mxu0 %vm55_vm1, %v28_v17  ;;  %819 = vmatprep.subr.mxu0 %v1065_v1 }
  0x22   :  { %748 = vmatprep.mubr.msk.f32.mxu0 %vm1066_vm0, %v1065_v1  ;;  %820 = vmatpush3.msra.mxu0 %v351_v32 }
  0x23   :  { %931 = vmatpush3.msra.mxu1 %v352_v30  ;;  %821 = vmatprep.subr.mxu0 %v1065_v1 }
  0x24   :  { %822 = vmatpush3.msra.mxu0 %v350_v33  ;;  %916 = vmatprep.subr.mxu1 %v1065_v1 }
  0x25   :  { %749 = vmatmul.mubr.msk.f32.gmra.mxu0 %vm55_vm1, %v29_v18  ;;  %823 = vmatprep.subr.mxu0 %v1065_v1 }
  0x26   :  { %751 = vmatprep.mubr.msk.f32.mxu0 %vm1066_vm0, %v1065_v1  ;;  %824 = vmatpush3.msra.mxu0 %v349_v35 }
  0x27   :  { %932 = vmatpush3.msra.mxu1 %v351_v32  ;;  %825 = vmatprep.subr.mxu0 %v1065_v1 }
  0x28   :  { %826 = vmatpush3.msra.mxu0 %v348_v36  ;;  %917 = vmatprep.subr.mxu1 %v1065_v1 }
  0x29   :  { %752 = vmatmul.mubr.msk.f32.gmra.mxu0 %vm55_vm1, %v30_v19  ;;  %827 = vmatprep.subr.mxu0 %v1065_v1 }
  0x2a   :  { %754 = vmatprep.mubr.msk.f32.mxu0 %vm1066_vm0, %v1065_v1  ;;  %828 = vmatpush3.msra.mxu0 %v347_v38 }
  0x2b   :  { %933 = vmatpush3.msra.mxu1 %v350_v33  ;;  %829 = vmatprep.subr.mxu0 %v1065_v1 }
  0x2c   :  { %830 = vmatpush3.msra.mxu0 %v346_v39  ;;  %918 = vmatprep.subr.mxu1 %v1065_v1 }
  0x2d   :  { %755 = vmatmul.mubr.msk.f32.gmra.mxu0 %vm55_vm1, %v31_v20  ;;  %934 = vmatpush3.msra.mxu1 %v349_v35 }
  0x2e   :  { %757 = vmatprep.mubr.msk.f32.mxu0 %vm1066_vm0, %v1065_v1  ;;  %919 = vmatprep.subr.mxu1 %v1065_v1 }
  0x2f   :  { %935 = vmatpush3.msra.mxu1 %v348_v36 }
  0x30   :  { %920 = vmatprep.subr.mxu1 %v1065_v1 }
  0x31   :  { %758 = vmatmul.mubr.msk.f32.gmra.mxu0 %vm55_vm1, %v32_v21  ;;  %936 = vmatpush3.msra.mxu1 %v347_v38 }
  0x32   :  { %760 = vmatprep.mubr.msk.f32.mxu0 %vm1066_vm0, %v1065_v1  ;;  %921 = vmatprep.subr.mxu1 %v1065_v1 }
  0x33   :  { %937 = vmatpush3.msra.mxu1 %v346_v39 }
  0x35   :  { %761 = vmatmul.mubr.msk.f32.gmra.mxu0 %vm55_vm1, %v33_v22 }
  0x36   :  { %763 = vmatprep.mubr.msk.f32.mxu0 %vm1066_vm0, %v1065_v1 }
  0x39   :  { %764 = vmatmul.mubr.msk.f32.gmra.mxu0 %vm55_vm1, %v34_v23 }
  0x3a   :  { %766 = vmatprep.mubr.msk.f32.mxu0 %vm1066_vm0, %v1065_v1 }
  0x3d   :  { %767 = vmatmul.mubr.msk.f32.gmra.mxu0 %vm55_vm1, %v35_v24 }
  0x3e   :  { %769 = vmatprep.mubr.msk.f32.mxu0 %vm1066_vm0, %v1065_v1 }
  0x41   :  { %770 = vmatmul.mubr.msk.f32.gmra.mxu0 %vm55_vm1, %v36_v25 }
  0x42   :  { %772 = vmatprep.mubr.msk.f32.mxu0 %vm1066_vm0, %v1065_v1 }
  0x45   :  { %773 = vmatmul.mubr.msk.f32.gmra.mxu0 %vm55_vm1, %v37_v26 }
  0x46   :  { %775 = vmatprep.mubr.msk.f32.mxu0 %vm1066_vm0, %v1065_v1 }
  0x49   :  { %776 = vmatmul.mubr.msk.f32.gmra.mxu0 %vm55_vm1, %v38_v28 }
  0x4a   :  { %778 = vmatprep.mubr.msk.f32.mxu0 %vm1066_vm0, %v1065_v1 }
  0x4d   :  { %779 = vmatmul.mubr.msk.f32.gmra.mxu0 %vm55_vm1, %v39_v31 }
  0x4e   :  { %781 = vmatprep.mubr.msk.f32.mxu0 %vm1066_vm0, %v1065_v1 }
  0x51   :  { %782 = vmatmul.mubr.msk.f32.gmra.mxu0 %vm55_vm1, %v40_v34 }
  0x52   :  { %784 = vmatprep.mubr.msk.f32.mxu0 %vm1066_vm0, %v1065_v1 }
  0x55   :  { %785 = vmatmul.mubr.msk.f32.gmra.mxu0 %vm55_vm1, %v41_v37 }
  0x56   :  { %787 = vmatprep.mubr.msk.f32.mxu0 %vm1066_vm0, %v1065_v1 }
  0x59   :  { %788 = vmatmul.mubr.msk.f32.gmra.mxu0 %vm55_vm1, %v42_v40 }
  0x5a   :  { %790 = vmatprep.mubr.msk.f32.mxu0 %vm1066_vm0, %v1065_v1 }
  0x5d   :  { %791 = vmatmul.mubr.msk.f32.gmra.mxu0 %vm55_vm1, %v43_v41 }
  0x5e   :  { %793 = vmatprep.mubr.msk.f32.mxu0 %vm1066_vm0, %v1065_v1 }
  0x61   :  { %794 = vmatmul.mubr.msk.f32.gmra.mxu0 %vm55_vm1, %v44_v42 }
  0x62   :  { %796 = vmatprep.mubr.msk.f32.mxu0 %vm1066_vm0, %v1065_v1 }
  0x65   :  { %797 = vmatmul.mubr.msk.f32.gmra.mxu0 %vm55_vm1, %v45_v43 }
  0x66   :  { %831 = vmatprep.mubr.msk.f32.mxu0 %vm1066_vm0, %v1065_v1 }
  0xc5   :  { %v197_v45 = vpop.f32.mrf.mxu0 }
  0xc6   :  { %v198_v46 = vadd.f32 %v1345_v44, %v197_v45 }
  0xc7   :  { %v726_v47 = vpop.f32.mrf.mxu0 }
  0xc8   :  { %943 = vtanh.f32 %v198_v46 }
  0xc9   :  { %v202_v48 = vpop.f32.mrf.mxu0 }
  0xca   :  { %v203_v49 = vadd.f32 %v1345_v44, %v202_v48 }
  0xcb   :  { %v729_v50 = vpop.f32.mrf.mxu0 }
  0xcc   :  { %945 = vtanh.f32 %v203_v49 }
  0xcd   :  { %v207_v51 = vpop.f32.mrf.mxu0 }
  0xce   :  { %v208_v52 = vadd.f32 %v1345_v44, %v207_v51 }
  0xcf   :  { %v732_v53 = vpop.f32.mrf.mxu0 }
  0xd0   :  { %947 = vtanh.f32 %v208_v52 }
  0xd1   :  { %v212_v54 = vpop.f32.mrf.mxu0 }
  0xd2   :  { %v213_v55 = vadd.f32 %v1345_v44, %v212_v54 }
  0xd3   :  { %v735_v56 = vpop.f32.mrf.mxu0 }
  0xd4   :  { %949 = vtanh.f32 %v213_v55 }
  0xd5   :  { %v944_v57 = vpop.eup %943  ;;  %v217_v58 = vpop.f32.mrf.mxu0 }
  0xd6   :  { %v218_v59 = vadd.f32 %v1345_v44, %v217_v58  ;;  %832 = vmatmul.mubr.f32.vlgmr.msra.gmra.mxu0 %v944_v57 }
  0xd7   :  { %v738_v60 = vpop.f32.mrf.mxu0  ;;  %834 = vmatprep.mubr.msk.f32.mxu0 %vm1066_vm0, %v1065_v1 }
  0xd8   :  { %951 = vtanh.f32 %v218_v59 }
  0xd9   :  { %v946_v61 = vpop.eup %945  ;;  %v222_v62 = vpop.f32.mrf.mxu0 }
  0xda   :  { %v223_v63 = vadd.f32 %v1345_v44, %v222_v62  ;;  %835 = vmatmul.mubr.f32.gmra.mxu0 %v946_v61 }
  0xdb   :  { %v741_v0 = vpop.f32.mrf.mxu0  ;;  %837 = vmatprep.mubr.msk.f32.mxu0 %vm1066_vm0, %v1065_v1 }
  0xdc   :  { %953 = vtanh.f32 %v223_v63 }
  0xdd   :  { %v948_v2 = vpop.eup %947  ;;  %v227_v3 = vpop.f32.mrf.mxu0 }
  0xde   :  { %v228_v4 = vadd.f32 %v1345_v44, %v227_v3  ;;  %838 = vmatmul.mubr.f32.gmra.mxu0 %v948_v2 }
  0xdf   :  { %v744_v5 = vpop.f32.mrf.mxu0 }
  0xe0   :  { %955 = vtanh.f32 %v228_v4 }
  0xe1   :  { %v950_v6 = vpop.eup %949  ;;  %v232_v7 = vpop.f32.mrf.mxu0 }
  0xe2   :  { %v233_v8 = vadd.f32 %v1345_v44, %v232_v7  ;;  %841 = vmatmul.mubr.f32.vlgmr.msra.gmra.mxu1 %v950_v6 }
  0xe3   :  { %v747_v9 = vpop.f32.mrf.mxu0  ;;  %843 = vmatprep.mubr.msk.f32.mxu1 %vm1066_vm0, %v1065_v1 }
  0xe4   :  { %957 = vtanh.f32 %v233_v8 }
  0xe5   :  { %v952_v10 = vpop.eup %951  ;;  %v237_v11 = vpop.f32.mrf.mxu0 }
  0xe6   :  { %v238_v12 = vadd.f32 %v1345_v44, %v237_v11  ;;  %844 = vmatmul.mubr.f32.gmra.mxu1 %v952_v10 }
  0xe7   :  { %v750_v13 = vpop.f32.mrf.mxu0  ;;  %846 = vmatprep.mubr.msk.f32.mxu1 %vm1066_vm0, %v1065_v1 }
  0xe8   :  { %959 = vtanh.f32 %v238_v12 }
  0xe9   :  { %v954_v14 = vpop.eup %953  ;;  %v242_v15 = vpop.f32.mrf.mxu0 }
  0xea   :  { %v243_v16 = vadd.f32 %v1345_v44, %v242_v15  ;;  %847 = vmatmul.mubr.f32.gmra.mxu1 %v954_v14 }
  0xeb   :  { %v753_v17 = vpop.f32.mrf.mxu0  ;;  %849 = vmatprep.mubr.msk.f32.mxu1 %vm1066_vm0, %v1065_v1 }
  0xec   :  { %961 = vtanh.f32 %v243_v16 }
  0xed   :  { %v956_v18 = vpop.eup %955  ;;  %v247_v19 = vpop.f32.mrf.mxu0 }
  0xee   :  { %v248_v20 = vadd.f32 %v1345_v44, %v247_v19  ;;  %850 = vmatmul.mubr.f32.gmra.mxu1 %v956_v18  ;;  %v1421_v19 = vld [vmem:[%s1455_s4] ss:$0 sm:$0xff]  ;;  %s1067_s4 = smov [#allocation2]  }
  0xef   :  { %v756_v21 = vpop.f32.mrf.mxu0  ;;  %852 = vmatprep.mubr.msk.f32.mxu1 %vm1066_vm0, %v1065_v1  ;;  %s614_s26 = sshll.u32 %s1067_s4, 4  ;;  %s615_s26 = int_to_ptr.vmem [resolvable:$true] %s614_s26 }
  0xf0   :  { %963 = vtanh.f32 %v248_v20  ;;  %s1043_s27 = scalar_lea.vmem %s615_s26, 3200  ;;  %p1048_p1 = scmp.lt.s32.totalorder %s615_s26, %s615_s26 }
  0xf1   :  { %v958_v22 = vpop.eup %957  ;;  %v252_v23 = vpop.f32.mrf.mxu0  ;;  %p1044_p0 = scmp.ne.s32.totalorder %s615_s26, %s1043_s27  ;;  %p1049_p2 = scmp.lt.s32.totalorder %s1043_s27, %s1043_s27 }
  0xf2   :  { %v253_v24 = vadd.f32 %v1345_v44, %v252_v23  ;;  %853 = vmatmul.mubr.f32.gmra.mxu1 %v958_v22 }
  0xf3   :  { %v759_v25 = vpop.f32.mrf.mxu0  ;;  %855 = vmatprep.mubr.msk.f32.mxu1 %vm1066_vm0, %v1065_v1  ;;  %p1050_p3 = por %p1049_p2, %p1048_p1 }
  0xf4   :  { %965 = vtanh.f32 %v253_v24 }
  0xf5   :  { %v960_v26 = vpop.eup %959  ;;  %v257_v27 = vpop.f32.mrf.mxu0  ;;  %p1051_p4 = pnand %p1050_p3, %p1044_p0 }
  0xf6   :  { %v258_v28 = vadd.f32 %v1345_v44, %v257_v27  ;;  %856 = vmatmul.mubr.f32.gmra.mxu1 %v960_v26 }
  0xf7   :  { %v762_v29 = vpop.f32.mrf.mxu0  ;;  %858 = vmatprep.mubr.msk.f32.mxu1 %vm1066_vm0, %v1065_v1 }
  0xf8   :  { %967 = vtanh.f32 %v258_v28 }
  0xf9   :  { %v962_v30 = vpop.eup %961  ;;  %v262_v31 = vpop.f32.mrf.mxu0 }
  0xfa   :  { %v263_v32 = vadd.f32 %v1345_v44, %v262_v31  ;;  %859 = vmatmul.mubr.f32.gmra.mxu1 %v962_v30 }
  0xfb   :  { %v765_v33 = vpop.f32.mrf.mxu0  ;;  %861 = vmatprep.mubr.msk.f32.mxu1 %vm1066_vm0, %v1065_v1 }
  0xfc   :  { %969 = vtanh.f32 %v263_v32 }
  0xfd   :  { %v964_v34 = vpop.eup %963  ;;  %v267_v35 = vpop.f32.mrf.mxu0 }
  0xfe   :  { %v268_v36 = vadd.f32 %v1345_v44, %v267_v35  ;;  %862 = vmatmul.mubr.f32.gmra.mxu1 %v964_v34 }
  0xff   :  { %v768_v37 = vpop.f32.mrf.mxu0  ;;  %864 = vmatprep.mubr.msk.f32.mxu1 %vm1066_vm0, %v1065_v1 }
 0x100   :  { %971 = vtanh.f32 %v268_v36 }
 0x101   :  { %v966_v38 = vpop.eup %965  ;;  %v272_v39 = vpop.f32.mrf.mxu0 }
 0x102   :  { %v273_v40 = vadd.f32 %v1345_v44, %v272_v39  ;;  %865 = vmatmul.mubr.f32.gmra.mxu1 %v966_v38 }
 0x103   :  { %v771_v41 = vpop.f32.mrf.mxu0  ;;  %867 = vmatprep.mubr.msk.f32.mxu1 %vm1066_vm0, %v1065_v1 }
 0x104   :  { %973 = vtanh.f32 %v273_v40 }
 0x105   :  { %v968_v42 = vpop.eup %967  ;;  %v277_v43 = vpop.f32.mrf.mxu0 }
 0x106   :  { %v278_v45 = vadd.f32 %v1345_v44, %v277_v43  ;;  %868 = vmatmul.mubr.f32.gmra.mxu1 %v968_v42 }
 0x107   :  { %v774_v46 = vpop.f32.mrf.mxu0  ;;  %870 = vmatprep.mubr.msk.f32.mxu1 %vm1066_vm0, %v1065_v1 }
 0x108   :  { %975 = vtanh.f32 %v278_v45 }
 0x109   :  { %v970_v47 = vpop.eup %969  ;;  %v282_v48 = vpop.f32.mrf.mxu0 }
 0x10a   :  { %v283_v49 = vadd.f32 %v1345_v44, %v282_v48  ;;  %871 = vmatmul.mubr.f32.gmra.mxu1 %v970_v47 }
 0x10b   :  { %v777_v50 = vpop.f32.mrf.mxu0  ;;  %873 = vmatprep.mubr.msk.f32.mxu1 %vm1066_vm0, %v1065_v1 }
 0x10c   :  { %977 = vtanh.f32 %v283_v49 }
 0x10d   :  { %v972_v51 = vpop.eup %971  ;;  %v287_v52 = vpop.f32.mrf.mxu0 }
 0x10e   :  { %v288_v53 = vadd.f32 %v1345_v44, %v287_v52  ;;  %874 = vmatmul.mubr.f32.gmra.mxu1 %v972_v51 }
 0x10f   :  { %v780_v54 = vpop.f32.mrf.mxu0  ;;  %876 = vmatprep.mubr.msk.f32.mxu1 %vm1066_vm0, %v1065_v1 }
 0x110   :  { %979 = vtanh.f32 %v288_v53 }
 0x111   :  { %v974_v55 = vpop.eup %973  ;;  %v292_v56 = vpop.f32.mrf.mxu0 }
 0x112   :  { %v293_v57 = vadd.f32 %v1345_v44, %v292_v56  ;;  %877 = vmatmul.mubr.f32.gmra.mxu1 %v974_v55 }
 0x113   :  { %v783_v58 = vpop.f32.mrf.mxu0  ;;  %879 = vmatprep.mubr.msk.f32.mxu1 %vm1066_vm0, %v1065_v1 }
 0x114   :  { %981 = vtanh.f32 %v293_v57 }
 0x115   :  { %v976_v59 = vpop.eup %975  ;;  %v297_v60 = vpop.f32.mrf.mxu0 }
 0x116   :  { %v298_v61 = vadd.f32 %v1345_v44, %v297_v60  ;;  %880 = vmatmul.mubr.f32.gmra.mxu1 %v976_v59 }
 0x117   :  { %v786_v62 = vpop.f32.mrf.mxu0  ;;  %882 = vmatprep.mubr.msk.f32.mxu1 %vm1066_vm0, %v1065_v1 }
 0x118   :  { %983 = vtanh.f32 %v298_v61 }
 0x119   :  { %v978_v63 = vpop.eup %977  ;;  %v302_v0 = vpop.f32.mrf.mxu0 }
 0x11a   :  { %v303_v2 = vadd.f32 %v1345_v44, %v302_v0  ;;  %883 = vmatmul.mubr.f32.gmra.mxu1 %v978_v63 }
 0x11b   :  { %v789_v3 = vpop.f32.mrf.mxu0  ;;  %885 = vmatprep.mubr.msk.f32.mxu1 %vm1066_vm0, %v1065_v1 }
 0x11c   :  { %985 = vtanh.f32 %v303_v2 }
 0x11d   :  { %v980_v4 = vpop.eup %979  ;;  %v307_v5 = vpop.f32.mrf.mxu0 }
 0x11e   :  { %v308_v6 = vadd.f32 %v1345_v44, %v307_v5  ;;  %886 = vmatmul.mubr.f32.gmra.mxu1 %v980_v4 }
 0x11f   :  { %v792_v7 = vpop.f32.mrf.mxu0  ;;  %888 = vmatprep.mubr.msk.f32.mxu1 %vm1066_vm0, %v1065_v1 }
 0x120   :  { %987 = vtanh.f32 %v308_v6 }
 0x121   :  { %v982_v8 = vpop.eup %981  ;;  %v312_v9 = vpop.f32.mrf.mxu0 }
 0x122   :  { %v313_v10 = vadd.f32 %v1345_v44, %v312_v9  ;;  %889 = vmatmul.mubr.f32.gmra.mxu1 %v982_v8 }
 0x123   :  { %v795_v11 = vpop.f32.mrf.mxu0  ;;  %891 = vmatprep.mubr.msk.f32.mxu1 %vm1066_vm0, %v1065_v1 }
 0x124   :  { %989 = vtanh.f32 %v313_v10 }
 0x125   :  { %v984_v12 = vpop.eup %983  ;;  %v317_v13 = vpop.f32.mrf.mxu0 }
 0x126   :  { %v318_v14 = vadd.f32 %v1345_v44, %v317_v13  ;;  %892 = vmatmul.mubr.f32.gmra.mxu1 %v984_v12 }
 0x127   :  { %v798_v15 = vpop.f32.mrf.mxu0  ;;  %894 = vmatprep.mubr.msk.f32.mxu1 %vm1066_vm0, %v1065_v1 }
 0x128   :  { %991 = vtanh.f32 %v318_v14 }
 0x129   :  { %v986_v16 = vpop.eup %985 }
 0x12a   :  { %895 = vmatmul.mubr.f32.gmra.mxu1 %v986_v16 }
 0x12b   :  { %897 = vmatprep.mubr.msk.f32.mxu1 %vm1066_vm0, %v1065_v1 }
 0x12d   :  { %v988_v17 = vpop.eup %987 }
 0x12e   :  { %898 = vmatmul.mubr.f32.gmra.mxu1 %v988_v17 }
 0x12f   :  { %900 = vmatprep.mubr.msk.f32.mxu1 %vm1066_vm0, %v1065_v1 }
 0x131   :  { %v990_v18 = vpop.eup %989 }
 0x132   :  { %901 = vmatmul.mubr.f32.gmra.mxu1 %v990_v18 }
 0x133   :  { %903 = vmatprep.mubr.msk.f32.mxu1 %vm1066_vm0, %v1065_v1 }
 0x135   :  { %v992_v44 = vpop.eup %991 }
 0x136   :  { %904 = vmatmul.mubr.f32.gmra.mxu1 %v992_v44 }
 0x196   :  { %v435_v20 = vpop.f32.mrf.mxu0 }
 0x197   :  { %v436_v21 = vadd.f32 %v1421_v19, %v435_v20 }
 0x198   :  { %v833_v22 = vpop.f32.mrf.mxu0 }
 0x199   :  { %993 = vtanh.f32 %v436_v21 }
 0x19a   :  { %v440_v23 = vpop.f32.mrf.mxu0 }
 0x19b   :  { %v441_v24 = vadd.f32 %v1421_v19, %v440_v23 }
 0x19c   :  { %v836_v25 = vpop.f32.mrf.mxu0 }
 0x19d   :  { %995 = vtanh.f32 %v441_v24 }
 0x19e   :  { %v445_v26 = vpop.f32.mrf.mxu0 }
 0x19f   :  { %v446_v1 = vadd.f32 %v1421_v19, %v445_v26 }
 0x1a0   :  { %v839_v27 = vpop.f32.mrf.mxu0 }
 0x1a1   :  { %997 = vtanh.f32 %v446_v1 }
 0x1a2   :  { %v450_v28 = vpop.f32.mrf.mxu1 }
 0x1a3   :  { %v451_v29 = vadd.f32 %v1421_v19, %v450_v28 }
 0x1a4   :  { %v842_v30 = vpop.f32.mrf.mxu1 }
 0x1a5   :  { %999 = vtanh.f32 %v451_v29 }
 0x1a6   :  { %v994_v31 = vpop.eup %993  ;;  %v455_v32 = vpop.f32.mrf.mxu1 }
 0x1a7   :  { %584 = vst [vmem:[#allocation2] sm:$0xff] %v994_v31  ;;  %v456_v33 = vadd.f32 %v1421_v19, %v455_v32 }
 0x1a8   :  { %v845_v34 = vpop.f32.mrf.mxu1 }
 0x1a9   :  { %1001 = vtanh.f32 %v456_v33 }
 0x1aa   :  { %v996_v35 = vpop.eup %995  ;;  %v460_v36 = vpop.f32.mrf.mxu1 }
 0x1ab   :  { %585 = vst [vmem:[#allocation2 + $0x8] sm:$0xff] %v996_v35  ;;  %v461_v37 = vadd.f32 %v1421_v19, %v460_v36 }
 0x1ac   :  { %v848_v38 = vpop.f32.mrf.mxu1 }
 0x1ad   :  { %1003 = vtanh.f32 %v461_v37 }
 0x1ae   :  { %v998_v39 = vpop.eup %997  ;;  %v465_v40 = vpop.f32.mrf.mxu1 }
 0x1af   :  { %586 = vst [vmem:[#allocation2 + $0x10] sm:$0xff] %v998_v39  ;;  %v466_v41 = vadd.f32 %v1421_v19, %v465_v40 }
 0x1b0   :  { %v851_v42 = vpop.f32.mrf.mxu1 }
 0x1b1   :  { %1005 = vtanh.f32 %v466_v41 }
 0x1b2   :  { %v1000_v43 = vpop.eup %999  ;;  %v470_v45 = vpop.f32.mrf.mxu1 }
 0x1b3   :  { %587 = vst [vmem:[#allocation2 + $0x18] sm:$0xff] %v1000_v43  ;;  %v471_v46 = vadd.f32 %v1421_v19, %v470_v45 }
 0x1b4   :  { %v854_v47 = vpop.f32.mrf.mxu1 }
 0x1b5   :  { %1007 = vtanh.f32 %v471_v46 }
 0x1b6   :  { %v1002_v48 = vpop.eup %1001  ;;  %v475_v49 = vpop.f32.mrf.mxu1 }
 0x1b7   :  { %588 = vst [vmem:[#allocation2 + $0x20] sm:$0xff] %v1002_v48  ;;  %v476_v50 = vadd.f32 %v1421_v19, %v475_v49 }
 0x1b8   :  { %v857_v51 = vpop.f32.mrf.mxu1 }
 0x1b9   :  { %1009 = vtanh.f32 %v476_v50 }
 0x1ba   :  { %v1004_v52 = vpop.eup %1003  ;;  %v480_v53 = vpop.f32.mrf.mxu1 }
 0x1bb   :  { %589 = vst [vmem:[#allocation2 + $0x28] sm:$0xff] %v1004_v52  ;;  %v481_v54 = vadd.f32 %v1421_v19, %v480_v53 }
 0x1bc   :  { %v860_v55 = vpop.f32.mrf.mxu1 }
 0x1bd   :  { %1011 = vtanh.f32 %v481_v54 }
 0x1be   :  { %v1006_v56 = vpop.eup %1005  ;;  %v485_v57 = vpop.f32.mrf.mxu1 }
 0x1bf   :  { %590 = vst [vmem:[#allocation2 + $0x30] sm:$0xff] %v1006_v56  ;;  %v486_v58 = vadd.f32 %v1421_v19, %v485_v57 }
 0x1c0   :  { %v863_v59 = vpop.f32.mrf.mxu1 }
 0x1c1   :  { %1013 = vtanh.f32 %v486_v58 }
 0x1c2   :  { %v1008_v60 = vpop.eup %1007  ;;  %v490_v61 = vpop.f32.mrf.mxu1 }
 0x1c3   :  { %591 = vst [vmem:[#allocation2 + $0x38] sm:$0xff] %v1008_v60  ;;  %v491_v62 = vadd.f32 %v1421_v19, %v490_v61 }
 0x1c4   :  { %v866_v63 = vpop.f32.mrf.mxu1 }
 0x1c5   :  { %1015 = vtanh.f32 %v491_v62 }
 0x1c6   :  { %v1010_v0 = vpop.eup %1009  ;;  %v495_v2 = vpop.f32.mrf.mxu1 }
 0x1c7   :  { %592 = vst [vmem:[#allocation2 + $0x40] sm:$0xff] %v1010_v0  ;;  %v496_v3 = vadd.f32 %v1421_v19, %v495_v2 }
 0x1c8   :  { %v869_v4 = vpop.f32.mrf.mxu1 }
 0x1c9   :  { %1017 = vtanh.f32 %v496_v3 }
 0x1ca   :  { %v1012_v5 = vpop.eup %1011  ;;  %v500_v6 = vpop.f32.mrf.mxu1 }
 0x1cb   :  { %593 = vst [vmem:[#allocation2 + $0x48] sm:$0xff] %v1012_v5  ;;  %v501_v7 = vadd.f32 %v1421_v19, %v500_v6 }
 0x1cc   :  { %v872_v8 = vpop.f32.mrf.mxu1 }
 0x1cd   :  { %1019 = vtanh.f32 %v501_v7 }
 0x1ce   :  { %v1014_v9 = vpop.eup %1013  ;;  %v505_v10 = vpop.f32.mrf.mxu1 }
 0x1cf   :  { %594 = vst [vmem:[#allocation2 + $0x50] sm:$0xff] %v1014_v9  ;;  %v506_v11 = vadd.f32 %v1421_v19, %v505_v10 }
 0x1d0   :  { %v875_v12 = vpop.f32.mrf.mxu1 }
 0x1d1   :  { %1021 = vtanh.f32 %v506_v11 }
 0x1d2   :  { %v1016_v13 = vpop.eup %1015  ;;  %v510_v14 = vpop.f32.mrf.mxu1 }
 0x1d3   :  { %595 = vst [vmem:[#allocation2 + $0x58] sm:$0xff] %v1016_v13  ;;  %v511_v15 = vadd.f32 %v1421_v19, %v510_v14 }
 0x1d4   :  { %v878_v16 = vpop.f32.mrf.mxu1 }
 0x1d5   :  { %1023 = vtanh.f32 %v511_v15 }
 0x1d6   :  { %v1018_v17 = vpop.eup %1017  ;;  %v515_v18 = vpop.f32.mrf.mxu1 }
 0x1d7   :  { %596 = vst [vmem:[#allocation2 + $0x60] sm:$0xff] %v1018_v17  ;;  %v516_v44 = vadd.f32 %v1421_v19, %v515_v18 }
 0x1d8   :  { %v881_v20 = vpop.f32.mrf.mxu1 }
 0x1d9   :  { %1025 = vtanh.f32 %v516_v44 }
 0x1da   :  { %v1020_v21 = vpop.eup %1019  ;;  %v520_v22 = vpop.f32.mrf.mxu1 }
 0x1db   :  { %597 = vst [vmem:[#allocation2 + $0x68] sm:$0xff] %v1020_v21  ;;  %v521_v23 = vadd.f32 %v1421_v19, %v520_v22 }
 0x1dc   :  { %v884_v24 = vpop.f32.mrf.mxu1 }
 0x1dd   :  { %1027 = vtanh.f32 %v521_v23 }
 0x1de   :  { %v1022_v25 = vpop.eup %1021  ;;  %v525_v26 = vpop.f32.mrf.mxu1 }
 0x1df   :  { %598 = vst [vmem:[#allocation2 + $0x70] sm:$0xff] %v1022_v25  ;;  %v526_v1 = vadd.f32 %v1421_v19, %v525_v26 }
 0x1e0   :  { %v887_v27 = vpop.f32.mrf.mxu1 }
 0x1e1   :  { %1029 = vtanh.f32 %v526_v1 }
 0x1e2   :  { %v1024_v28 = vpop.eup %1023  ;;  %v530_v29 = vpop.f32.mrf.mxu1 }
 0x1e3   :  { %599 = vst [vmem:[#allocation2 + $0x78] sm:$0xff] %v1024_v28  ;;  %v531_v30 = vadd.f32 %v1421_v19, %v530_v29 }
 0x1e4   :  { %v890_v31 = vpop.f32.mrf.mxu1 }
 0x1e5   :  { %1031 = vtanh.f32 %v531_v30 }
 0x1e6   :  { %v1026_v32 = vpop.eup %1025  ;;  %v535_v33 = vpop.f32.mrf.mxu1 }
 0x1e7   :  { %600 = vst [vmem:[#allocation2 + $0x80] sm:$0xff] %v1026_v32  ;;  %v536_v34 = vadd.f32 %v1421_v19, %v535_v33 }
 0x1e8   :  { %v893_v35 = vpop.f32.mrf.mxu1 }
 0x1e9   :  { %1033 = vtanh.f32 %v536_v34 }
 0x1ea   :  { %v1028_v36 = vpop.eup %1027  ;;  %v540_v37 = vpop.f32.mrf.mxu1 }
 0x1eb   :  { %601 = vst [vmem:[#allocation2 + $0x88] sm:$0xff] %v1028_v36  ;;  %v541_v38 = vadd.f32 %v1421_v19, %v540_v37 }
 0x1ec   :  { %v896_v39 = vpop.f32.mrf.mxu1 }
 0x1ed   :  { %1035 = vtanh.f32 %v541_v38 }
 0x1ee   :  { %v1030_v40 = vpop.eup %1029  ;;  %v545_v41 = vpop.f32.mrf.mxu1 }
 0x1ef   :  { %602 = vst [vmem:[#allocation2 + $0x90] sm:$0xff] %v1030_v40  ;;  %v546_v42 = vadd.f32 %v1421_v19, %v545_v41 }
 0x1f0   :  { %v899_v43 = vpop.f32.mrf.mxu1 }
 0x1f1   :  { %1037 = vtanh.f32 %v546_v42 }
 0x1f2   :  { %v1032_v45 = vpop.eup %1031  ;;  %v550_v46 = vpop.f32.mrf.mxu1 }
 0x1f3   :  { %603 = vst [vmem:[#allocation2 + $0x98] sm:$0xff] %v1032_v45  ;;  %v551_v47 = vadd.f32 %v1421_v19, %v550_v46 }
 0x1f4   :  { %v902_v48 = vpop.f32.mrf.mxu1 }
 0x1f5   :  { %1039 = vtanh.f32 %v551_v47 }
 0x1f6   :  { %v1034_v49 = vpop.eup %1033  ;;  %v555_v50 = vpop.f32.mrf.mxu1 }
 0x1f7   :  { %604 = vst [vmem:[#allocation2 + $0xa0] sm:$0xff] %v1034_v49  ;;  %v556_v51 = vadd.f32 %v1421_v19, %v555_v50 }
 0x1f8   :  { %v905_v52 = vpop.f32.mrf.mxu1 }
 0x1f9   :  { %1041 = vtanh.f32 %v556_v51 }
 0x1fa   :  { %v1036_v53 = vpop.eup %1035 }
 0x1fb   :  { %605 = vst [vmem:[#allocation2 + $0xa8] sm:$0xff] %v1036_v53 }
 0x1fe   :  { %v1038_v54 = vpop.eup %1037 }
 0x1ff   :  { %606 = vst [vmem:[#allocation2 + $0xb0] sm:$0xff] %v1038_v54 }
 0x202   :  { %v1040_v55 = vpop.eup %1039 }
 0x203   :  { %607 = vst [vmem:[#allocation2 + $0xb8] sm:$0xff] %v1040_v55 }
 0x206   :  { %v1042_v56 = vpop.eup %1041 }
 0x207   :  { %608 = vst [vmem:[#allocation2 + $0xc0] sm:$0xff] %v1042_v56 }
 0x208   :  { %1054 = shalt.err (!%p1051_p4)
}
 0x209   :  { %s1068_s28 = smov 128   ;;  %s1069_s29 = smov 8  }
 0x20a   :  { %620 = dma.vmem_to_hbm [thread:$0]  %s615_s26, 3200, %s1456_s5, [#allocation3], %s1068_s28, %s1068_s28, %s1069_s29  }
 0x20b   :  { %1063 = dma.done.wait [#allocation3], 3200  }
 0x20c   :  { %1064 = vsyncadd [#allocation3], 4294964096 }
 0x20d   :  { %624 = vsyncpa [#allocation3], 1 }

</bundles_post_ra>
